<compile_context>
chip_gen: v5e
topology: v5e:2x2
jax: 0.10.0
libtpu: 0.0.40
codegen_flags: <defaults>
</compile_context>

<pallas_src>
import functools

import jax
import jax.numpy as jnp
from jax.experimental import pallas as pl
from jax.experimental.pallas import tpu as pltpu


def _round_up(x, m):
    return (x + m - 1) // m * m


def _pick_time_chunk(seq_len, cap=16):
    """Largest divisor of seq_len that is <= cap (bounds the per-chunk static unroll)."""
    best = 1
    for d in range(1, min(seq_len, cap) + 1):
        if seq_len % d == 0:
            best = d
    return best


def _pad_axis(a, axis, new_size):
    pad = [(0, 0)] * a.ndim
    pad[axis] = (0, new_size - a.shape[axis])
    return jnp.pad(a, pad)


def _gate_reorder_and_pad(w, H, H_pad):
    """w: (4H, ...) with PyTorch gate order (i, f, g, o) on axis 0.
    Returns (4*H_pad, ...): order (i, f, o, g), each gate block zero-padded to H_pad rows."""
    i_b, f_b, g_b, o_b = w[0:H], w[H:2 * H], w[2 * H:3 * H], w[3 * H:4 * H]
    blocks = [_pad_axis(b, 0, H_pad) for b in (i_b, f_b, o_b, g_b)]
    return jnp.concatenate(blocks, axis=0)


def _lstm_kernel(x_ref, wih_ref, whh_ref, b_ref, wfc_ref, bfc_ref, out_ref,
                 h_ref, c_ref, *, chunk: int, hidden_pad: int, input_size: int):
    """One (batch-tile, time-chunk) grid step.

    x_ref   : (chunk, B_tile, I)  time-major input chunk
    wih_ref : (I, 4*H_pad)        W_ih^T, gate order (i, f, o, g), per-gate zero-padded
    whh_ref : (H_pad, 4*H_pad)    W_hh^T, same layout
    b_ref   : (1, 4*H_pad)        b_ih + b_hh
    wfc_ref : (H_pad, C_pad)      W_fc^T
    bfc_ref : (1, C_pad)
    out_ref : (B_tile, C_pad)     logits (written only at the last time chunk)
    h_ref/c_ref : (B_tile, H_pad) carried hidden / cell state (VMEM scratch)
    """
    H = hidden_pad
    t_idx = pl.program_id(1)

    @pl.when(t_idx == 0)
    def _init():
        h_ref[...] = jnp.zeros_like(h_ref)
        c_ref[...] = jnp.zeros_like(c_ref)

    x = x_ref[...]                                        # (chunk, B, I)
    bias = b_ref[...].reshape(1, 1, 4 * H)

    # Input projection for the whole chunk, hoisted off the serial critical path.
    if input_size <= 4:
        # Tiny K: VPU broadcast mul-add instead of a K<8 MXU push.
        wih = wih_ref[...]                                # (I, 4H)
        x_proj = bias
        for k in range(input_size):
            x_proj = x_proj + x[:, :, k:k + 1] * wih[k:k + 1, :].reshape(1, 1, 4 * H)
    else:
        ck, bt, isz = x.shape
        x_proj = (jnp.dot(x.reshape(ck * bt, isz), wih_ref[...],
                          preferred_element_type=jnp.float32)
                  .reshape(ck, bt, 4 * H) + bias)

    whh = whh_ref[...]                                    # resident across the loop
    h = h_ref[...]
    c = c_ref[...]

    # Serial recurrence over this chunk (chunk <= 16 -> bounded static unroll;
    # longer sequences are handled by the time-chunk grid axis, not a bigger unroll).
    for t in range(chunk):
        gates = x_proj[t] + jnp.dot(h, whh, preferred_element_type=jnp.float32)  # (B, 4H)
        sg = jax.nn.sigmoid(gates[:, :3 * H])             # sigmoid only on (i, f, o) lanes
        g_g = jnp.tanh(gates[:, 3 * H:])                  # tanh only on g lanes
        i_g = sg[:, 0 * H:1 * H]                          # vreg-aligned views (H_pad = 128k)
        f_g = sg[:, 1 * H:2 * H]
        o_g = sg[:, 2 * H:3 * H]
        c = f_g * c + i_g * g_g
        h = o_g * jnp.tanh(c)

    h_ref[...] = h
    c_ref[...] = c

    # Classifier head on the final hidden state; lane-dense (C padded to 128) store.
    @pl.when(t_idx == pl.num_programs(1) - 1)
    def _finalize():
        out_ref[...] = (jnp.dot(h, wfc_ref[...], preferred_element_type=jnp.float32)
                        + bfc_ref[...]).astype(out_ref.dtype)


def lstm_classifier_forward(x, params, *, batch_tile=None, time_chunk_cap=16,
                            weights_dtype=jnp.float32):
    """x: (batch, seq, input_size) float32. Returns logits (batch, num_classes)."""
    B, T, I = x.shape
    H = params["w_hh"].shape[1]          # w_hh: (4H, H)
    C = params["w_fc"].shape[0]          # w_fc: (C, H)

    H_pad = _round_up(H, 128)            # lane tile -> gate slices are whole vregs
    C_pad = _round_up(C, 128)            # lane-dense output store
    B_pad = _round_up(B, 8)              # f32 sublane tile
    chunk = _pick_time_chunk(T, time_chunk_cap)
    num_chunks = T // chunk
    if batch_tile is None:
        batch_tile = B_pad               # one tile; use B_pad // 2 on v7x to split across 2 TCs
    assert B_pad % batch_tile == 0 and batch_tile % 8 == 0

    # Time-major input, batch padded to the sublane tile.
    x_tm = _pad_axis(jnp.transpose(x, (1, 0, 2)).astype(jnp.float32), 1, B_pad)  # (T, B_pad, I)

    # Weights in right-multiply form, gate order (i, f, o, g), per-gate zero-pad to H_pad.
    wih_t = _gate_reorder_and_pad(params["w_ih"].astype(jnp.float32), H, H_pad).T   # (I, 4H_pad)
    whh_r = _gate_reorder_and_pad(params["w_hh"].astype(jnp.float32), H, H_pad)     # (4H_pad, H)
    whh_t = _pad_axis(whh_r, 1, H_pad).T                                            # (H_pad, 4H_pad)
    bias = _gate_reorder_and_pad(
        (params["b_ih"] + params["b_hh"]).astype(jnp.float32), H, H_pad).reshape(1, 4 * H_pad)
    wfc_t = _pad_axis(_pad_axis(params["w_fc"].astype(jnp.float32), 1, H_pad), 0, C_pad).T
    bfc = _pad_axis(params["b_fc"].astype(jnp.float32), 0, C_pad).reshape(1, C_pad)

    wih_t = wih_t.astype(weights_dtype)   # bf16 recommended for real H (f32 accum kept)
    whh_t = whh_t.astype(weights_dtype)
    wfc_t = wfc_t.astype(weights_dtype)

    # Rough VMEM budget (double-buffered blocks + x_proj temp + scratch) with headroom.
    wbytes = jnp.dtype(weights_dtype).itemsize
    est = (2 * chunk * batch_tile * I * 4
           + 2 * (I * 4 * H_pad + H_pad * 4 * H_pad + H_pad * C_pad) * wbytes
           + 2 * (4 * H_pad + C_pad) * 4
           + chunk * batch_tile * 4 * H_pad * 4
           + 2 * batch_tile * H_pad * 4
           + 2 * batch_tile * C_pad * 4)
    vmem_limit = int(min(max(2 * est + (4 << 20), 16 << 20), 60 << 20))

    kernel = functools.partial(_lstm_kernel, chunk=chunk, hidden_pad=H_pad, input_size=I)

    out = pl.pallas_call(
        kernel,
        out_shape=jax.ShapeDtypeStruct((B_pad, C_pad), jnp.float32),
        grid=(B_pad // batch_tile, num_chunks),
        in_specs=[
            pl.BlockSpec((chunk, batch_tile, I), lambda b, t: (t, b, 0)),   # x, streamed over T
            pl.BlockSpec((I, 4 * H_pad), lambda b, t: (0, 0)),              # W_ih^T (resident)
            pl.BlockSpec((H_pad, 4 * H_pad), lambda b, t: (0, 0)),          # W_hh^T (resident)
            pl.BlockSpec((1, 4 * H_pad), lambda b, t: (0, 0)),              # bias
            pl.BlockSpec((H_pad, C_pad), lambda b, t: (0, 0)),              # W_fc^T
            pl.BlockSpec((1, C_pad), lambda b, t: (0, 0)),                  # b_fc
        ],
        out_specs=pl.BlockSpec((batch_tile, C_pad), lambda b, t: (b, 0)),
        scratch_shapes=[pltpu.VMEM((batch_tile, H_pad), jnp.float32),       # h carry
                        pltpu.VMEM((batch_tile, H_pad), jnp.float32)],      # c carry
        compiler_params=pltpu.CompilerParams(
            dimension_semantics=("parallel", "arbitrary"),
            vmem_limit_bytes=vmem_limit),
    )(x_tm, wih_t, whh_t, bias, wfc_t, bfc)

    return out[:B, :C]


def _reference_forward(x, params):
    """Pure-JAX reference matching PyTorch nn.LSTM + nn.Linear semantics."""
    B, T, I = x.shape
    H = params["w_hh"].shape[1]
    h = jnp.zeros((B, H), jnp.float32)
    c = jnp.zeros((B, H), jnp.float32)
    b = params["b_ih"] + params["b_hh"]
    for t in range(T):
        gates = x[:, t, :] @ params["w_ih"].T + h @ params["w_hh"].T + b
        i_g = jax.nn.sigmoid(gates[:, 0 * H:1 * H])
        f_g = jax.nn.sigmoid(gates[:, 1 * H:2 * H])
        g_g = jnp.tanh(gates[:, 2 * H:3 * H])
        o_g = jax.nn.sigmoid(gates[:, 3 * H:4 * H])
        c = f_g * c + i_g * g_g
        h = o_g * jnp.tanh(c)
    return h @ params["w_fc"].T + params["b_fc"]


def init_params(key, input_size=1, hidden_size=32, num_classes=2):
    """Deterministic init mimicking PyTorch's uniform(-1/sqrt(H), 1/sqrt(H))."""
    ks = jax.random.split(key, 6)
    s = 1.0 / jnp.sqrt(hidden_size)
    u = lambda k, shape: jax.random.uniform(k, shape, jnp.float32, -s, s)
    return {
        "w_ih": u(ks[0], (4 * hidden_size, input_size)),
        "w_hh": u(ks[1], (4 * hidden_size, hidden_size)),
        "b_ih": u(ks[2], (4 * hidden_size,)),
        "b_hh": u(ks[3], (4 * hidden_size,)),
        "w_fc": u(ks[4], (num_classes, hidden_size)),
        "b_fc": u(ks[5], (num_classes,)),
    }


if __name__ == "__main__":
    key = jax.random.PRNGKey(0)
    k_x, k_p = jax.random.split(key)

    batch, seq, input_size = 2, 8, 1
    hidden_size, num_classes = 32, 2

    x = jax.random.normal(k_x, (batch, seq, input_size), jnp.float32)
    params = init_params(k_p, input_size, hidden_size, num_classes)

    logits = lstm_classifier_forward(x, params)
    logits = jax.block_until_ready(logits)

    ref = _reference_forward(x, params)
    assert logits.shape == (batch, num_classes)
    assert jnp.allclose(logits, ref, atol=1e-4, rtol=1e-4), (logits, ref)

    print("KERNEL_OK")
</pallas_src>

<mosaic_0001>
module attributes {stable_mosaic.version = 11 : i64} {
  func.func @_lstm_kernel(%arg0: i32, %arg1: i32, %arg2: memref<8x8x1xf32, #tpu.memory_space<vmem>>, %arg3: memref<1x512xf32, #tpu.memory_space<vmem>>, %arg4: memref<128x512xf32, #tpu.memory_space<vmem>>, %arg5: memref<1x512xf32, #tpu.memory_space<vmem>>, %arg6: memref<128x128xf32, #tpu.memory_space<vmem>>, %arg7: memref<1x128xf32, #tpu.memory_space<vmem>>, %arg8: memref<8x128xf32, #tpu.memory_space<vmem>>, %arg9: memref<8x128xf32, #tpu.memory_space<vmem>>, %arg10: memref<8x128xf32, #tpu.memory_space<vmem>>) attributes {dimension_semantics = [#tpu.dimension_semantics<parallel>, #tpu.dimension_semantics<arbitrary>], iteration_bounds = array<i64: 1, 1>, scalar_prefetch = 0 : i64, scratch_operands = 2 : i64, tpu.core_type = #tpu.core_type<tc>, window_params = [{transform_indices = @transform_0, window_bounds = array<i64: 8, 8, 1>}, {pipeline_mode = #tpu.pipeline_mode<synchronous>, transform_indices = @transform_1, window_bounds = array<i64: 1, 512>}, {pipeline_mode = #tpu.pipeline_mode<synchronous>, transform_indices = @transform_2, window_bounds = array<i64: 128, 512>}, {pipeline_mode = #tpu.pipeline_mode<synchronous>, transform_indices = @transform_3, window_bounds = array<i64: 1, 512>}, {pipeline_mode = #tpu.pipeline_mode<synchronous>, transform_indices = @transform_4, window_bounds = array<i64: 128, 128>}, {pipeline_mode = #tpu.pipeline_mode<synchronous>, transform_indices = @transform_5, window_bounds = array<i64: 1, 128>}, {transform_indices = @transform_6, window_bounds = array<i64: 8, 128>}]} {
    %c0_i32 = arith.constant 0 : i32
    %0 = arith.cmpi eq, %arg1, %c0_i32 : i32
    %1 = arith.extui %0 : i1 to i32
    %c0_i32_0 = arith.constant 0 : i32
    %2 = arith.cmpi ne, %1, %c0_i32_0 : i32
    scf.if %2 {
      %cst_34 = arith.constant 0.000000e+00 : f32
      %181 = vector.broadcast %cst_34 : f32 to vector<8x128xf32>
      %c0_35 = arith.constant 0 : index
      %c0_36 = arith.constant 0 : index
      %182 = vector.load %arg9[%c0_35, %c0_36] : memref<8x128xf32, #tpu.memory_space<vmem>>, vector<8x128xf32>
      tpu.vector_store %arg9[%c0_35, %c0_36], %181 {strides = array<i32>} : memref<8x128xf32, #tpu.memory_space<vmem>>, vector<8x128xf32>,
      %cst_37 = arith.constant 0.000000e+00 : f32
      %183 = vector.broadcast %cst_37 : f32 to vector<8x128xf32>
      %c0_38 = arith.constant 0 : index
      %c0_39 = arith.constant 0 : index
      %184 = vector.load %arg10[%c0_38, %c0_39] : memref<8x128xf32, #tpu.memory_space<vmem>>, vector<8x128xf32>
      tpu.vector_store %arg10[%c0_38, %c0_39], %183 {strides = array<i32>} : memref<8x128xf32, #tpu.memory_space<vmem>>, vector<8x128xf32>,
    } else {
    }
    %c0 = arith.constant 0 : index
    %c0_1 = arith.constant 0 : index
    %c0_2 = arith.constant 0 : index
    %3 = vector.load %arg2[%c0, %c0_1, %c0_2] : memref<8x8x1xf32, #tpu.memory_space<vmem>>, vector<8x8x1xf32>
    %c0_3 = arith.constant 0 : index
    %c0_4 = arith.constant 0 : index
    %4 = vector.load %arg5[%c0_3, %c0_4] : memref<1x512xf32, #tpu.memory_space<vmem>>, vector<1x512xf32>
    %5 = vector.shape_cast %4 : vector<1x512xf32> to vector<1x1x512xf32>
    %c0_5 = arith.constant 0 : index
    %c0_6 = arith.constant 0 : index
    %6 = vector.load %arg3[%c0_5, %c0_6] : memref<1x512xf32, #tpu.memory_space<vmem>>, vector<1x512xf32>
    %7 = vector.shape_cast %6 : vector<1x512xf32> to vector<1x1x512xf32>
    %8 = vector.broadcast %3 : vector<8x8x1xf32> to vector<8x8x512xf32>
    %9 = vector.broadcast %7 : vector<1x1x512xf32> to vector<8x8x512xf32>
    %10 = arith.mulf %8, %9 : vector<8x8x512xf32>
    %11 = vector.broadcast %5 : vector<1x1x512xf32> to vector<8x8x512xf32>
    %12 = arith.addf %11, %10 : vector<8x8x512xf32>
    %c0_7 = arith.constant 0 : index
    %c0_8 = arith.constant 0 : index
    %13 = vector.load %arg4[%c0_7, %c0_8] : memref<128x512xf32, #tpu.memory_space<vmem>>, vector<128x512xf32>
    %c0_9 = arith.constant 0 : index
    %c0_10 = arith.constant 0 : index
    %14 = vector.load %arg9[%c0_9, %c0_10] : memref<8x128xf32, #tpu.memory_space<vmem>>, vector<8x128xf32>
    %c0_11 = arith.constant 0 : index
    %c0_12 = arith.constant 0 : index
    %15 = vector.load %arg10[%c0_11, %c0_12] : memref<8x128xf32, #tpu.memory_space<vmem>>, vector<8x128xf32>
    %16 = vector.extract_strided_slice %12 {offsets = [0, 0, 0], sizes = [1, 8, 512], strides = [1, 1, 1]} : vector<8x8x512xf32> to vector<1x8x512xf32>
    %17 = vector.shape_cast %16 : vector<1x8x512xf32> to vector<8x512xf32>
    %cst = arith.constant dense<0.000000e+00> : vector<8x512xf32>
    %18 = tpu.matmul %14, %13, %cst {dimension_numbers = #tpu.dot_dimension_numbers<[1], [0], [0], [1], [0, 0, 1, 1], [], []>} : vector<8x128xf32>, vector<128x512xf32>, vector<8x512xf32> -> vector<8x512xf32>
    %19 = arith.addf %17, %18 : vector<8x512xf32>
    %20 = vector.extract_strided_slice %19 {offsets = [0, 0], sizes = [8, 384], strides = [1, 1]} : vector<8x512xf32> to vector<8x384xf32>
    %21 = arith.negf %20 : vector<8x384xf32>
    %22 = math.exp %21 : vector<8x384xf32>
    %cst_13 = arith.constant 1.000000e+00 : f32
    %23 = vector.broadcast %cst_13 : f32 to vector<8x384xf32>
    %24 = arith.addf %23, %22 : vector<8x384xf32>
    %25 = arith.divf %23, %24 : vector<8x384xf32>
    %26 = vector.extract_strided_slice %19 {offsets = [0, 384], sizes = [8, 128], strides = [1, 1]} : vector<8x512xf32> to vector<8x128xf32>
    %27 = math.tanh %26 : vector<8x128xf32>
    %28 = vector.extract_strided_slice %25 {offsets = [0, 0], sizes = [8, 128], strides = [1, 1]} : vector<8x384xf32> to vector<8x128xf32>
    %29 = vector.extract_strided_slice %25 {offsets = [0, 128], sizes = [8, 128], strides = [1, 1]} : vector<8x384xf32> to vector<8x128xf32>
    %30 = vector.extract_strided_slice %25 {offsets = [0, 256], sizes = [8, 128], strides = [1, 1]} : vector<8x384xf32> to vector<8x128xf32>
    %31 = arith.mulf %29, %15 : vector<8x128xf32>
    %32 = arith.mulf %28, %27 : vector<8x128xf32>
    %33 = arith.addf %31, %32 : vector<8x128xf32>
    %34 = math.tanh %33 : vector<8x128xf32>
    %35 = arith.mulf %30, %34 : vector<8x128xf32>
    %36 = vector.extract_strided_slice %12 {offsets = [1, 0, 0], sizes = [1, 8, 512], strides = [1, 1, 1]} : vector<8x8x512xf32> to vector<1x8x512xf32>
    %37 = vector.shape_cast %36 : vector<1x8x512xf32> to vector<8x512xf32>
    %cst_14 = arith.constant dense<0.000000e+00> : vector<8x512xf32>
    %38 = tpu.matmul %35, %13, %cst_14 {dimension_numbers = #tpu.dot_dimension_numbers<[1], [0], [0], [1], [0, 0, 1, 1], [], []>} : vector<8x128xf32>, vector<128x512xf32>, vector<8x512xf32> -> vector<8x512xf32>
    %39 = arith.addf %37, %38 : vector<8x512xf32>
    %40 = vector.extract_strided_slice %39 {offsets = [0, 0], sizes = [8, 384], strides = [1, 1]} : vector<8x512xf32> to vector<8x384xf32>
    %41 = arith.negf %40 : vector<8x384xf32>
    %42 = math.exp %41 : vector<8x384xf32>
    %cst_15 = arith.constant 1.000000e+00 : f32
    %43 = vector.broadcast %cst_15 : f32 to vector<8x384xf32>
    %44 = arith.addf %43, %42 : vector<8x384xf32>
    %45 = arith.divf %43, %44 : vector<8x384xf32>
    %46 = vector.extract_strided_slice %39 {offsets = [0, 384], sizes = [8, 128], strides = [1, 1]} : vector<8x512xf32> to vector<8x128xf32>
    %47 = math.tanh %46 : vector<8x128xf32>
    %48 = vector.extract_strided_slice %45 {offsets = [0, 0], sizes = [8, 128], strides = [1, 1]} : vector<8x384xf32> to vector<8x128xf32>
    %49 = vector.extract_strided_slice %45 {offsets = [0, 128], sizes = [8, 128], strides = [1, 1]} : vector<8x384xf32> to vector<8x128xf32>
    %50 = vector.extract_strided_slice %45 {offsets = [0, 256], sizes = [8, 128], strides = [1, 1]} : vector<8x384xf32> to vector<8x128xf32>
    %51 = arith.mulf %49, %33 : vector<8x128xf32>
    %52 = arith.mulf %48, %47 : vector<8x128xf32>
    %53 = arith.addf %51, %52 : vector<8x128xf32>
    %54 = math.tanh %53 : vector<8x128xf32>
    %55 = arith.mulf %50, %54 : vector<8x128xf32>
    %56 = vector.extract_strided_slice %12 {offsets = [2, 0, 0], sizes = [1, 8, 512], strides = [1, 1, 1]} : vector<8x8x512xf32> to vector<1x8x512xf32>
    %57 = vector.shape_cast %56 : vector<1x8x512xf32> to vector<8x512xf32>
    %cst_16 = arith.constant dense<0.000000e+00> : vector<8x512xf32>
    %58 = tpu.matmul %55, %13, %cst_16 {dimension_numbers = #tpu.dot_dimension_numbers<[1], [0], [0], [1], [0, 0, 1, 1], [], []>} : vector<8x128xf32>, vector<128x512xf32>, vector<8x512xf32> -> vector<8x512xf32>
    %59 = arith.addf %57, %58 : vector<8x512xf32>
    %60 = vector.extract_strided_slice %59 {offsets = [0, 0], sizes = [8, 384], strides = [1, 1]} : vector<8x512xf32> to vector<8x384xf32>
    %61 = arith.negf %60 : vector<8x384xf32>
    %62 = math.exp %61 : vector<8x384xf32>
    %cst_17 = arith.constant 1.000000e+00 : f32
    %63 = vector.broadcast %cst_17 : f32 to vector<8x384xf32>
    %64 = arith.addf %63, %62 : vector<8x384xf32>
    %65 = arith.divf %63, %64 : vector<8x384xf32>
    %66 = vector.extract_strided_slice %59 {offsets = [0, 384], sizes = [8, 128], strides = [1, 1]} : vector<8x512xf32> to vector<8x128xf32>
    %67 = math.tanh %66 : vector<8x128xf32>
    %68 = vector.extract_strided_slice %65 {offsets = [0, 0], sizes = [8, 128], strides = [1, 1]} : vector<8x384xf32> to vector<8x128xf32>
    %69 = vector.extract_strided_slice %65 {offsets = [0, 128], sizes = [8, 128], strides = [1, 1]} : vector<8x384xf32> to vector<8x128xf32>
    %70 = vector.extract_strided_slice %65 {offsets = [0, 256], sizes = [8, 128], strides = [1, 1]} : vector<8x384xf32> to vector<8x128xf32>
    %71 = arith.mulf %69, %53 : vector<8x128xf32>
    %72 = arith.mulf %68, %67 : vector<8x128xf32>
    %73 = arith.addf %71, %72 : vector<8x128xf32>
    %74 = math.tanh %73 : vector<8x128xf32>
    %75 = arith.mulf %70, %74 : vector<8x128xf32>
    %76 = vector.extract_strided_slice %12 {offsets = [3, 0, 0], sizes = [1, 8, 512], strides = [1, 1, 1]} : vector<8x8x512xf32> to vector<1x8x512xf32>
    %77 = vector.shape_cast %76 : vector<1x8x512xf32> to vector<8x512xf32>
    %cst_18 = arith.constant dense<0.000000e+00> : vector<8x512xf32>
    %78 = tpu.matmul %75, %13, %cst_18 {dimension_numbers = #tpu.dot_dimension_numbers<[1], [0], [0], [1], [0, 0, 1, 1], [], []>} : vector<8x128xf32>, vector<128x512xf32>, vector<8x512xf32> -> vector<8x512xf32>
    %79 = arith.addf %77, %78 : vector<8x512xf32>
    %80 = vector.extract_strided_slice %79 {offsets = [0, 0], sizes = [8, 384], strides = [1, 1]} : vector<8x512xf32> to vector<8x384xf32>
    %81 = arith.negf %80 : vector<8x384xf32>
    %82 = math.exp %81 : vector<8x384xf32>
    %cst_19 = arith.constant 1.000000e+00 : f32
    %83 = vector.broadcast %cst_19 : f32 to vector<8x384xf32>
    %84 = arith.addf %83, %82 : vector<8x384xf32>
    %85 = arith.divf %83, %84 : vector<8x384xf32>
    %86 = vector.extract_strided_slice %79 {offsets = [0, 384], sizes = [8, 128], strides = [1, 1]} : vector<8x512xf32> to vector<8x128xf32>
    %87 = math.tanh %86 : vector<8x128xf32>
    %88 = vector.extract_strided_slice %85 {offsets = [0, 0], sizes = [8, 128], strides = [1, 1]} : vector<8x384xf32> to vector<8x128xf32>
    %89 = vector.extract_strided_slice %85 {offsets = [0, 128], sizes = [8, 128], strides = [1, 1]} : vector<8x384xf32> to vector<8x128xf32>
    %90 = vector.extract_strided_slice %85 {offsets = [0, 256], sizes = [8, 128], strides = [1, 1]} : vector<8x384xf32> to vector<8x128xf32>
    %91 = arith.mulf %89, %73 : vector<8x128xf32>
    %92 = arith.mulf %88, %87 : vector<8x128xf32>
    %93 = arith.addf %91, %92 : vector<8x128xf32>
    %94 = math.tanh %93 : vector<8x128xf32>
    %95 = arith.mulf %90, %94 : vector<8x128xf32>
    %96 = vector.extract_strided_slice %12 {offsets = [4, 0, 0], sizes = [1, 8, 512], strides = [1, 1, 1]} : vector<8x8x512xf32> to vector<1x8x512xf32>
    %97 = vector.shape_cast %96 : vector<1x8x512xf32> to vector<8x512xf32>
    %cst_20 = arith.constant dense<0.000000e+00> : vector<8x512xf32>
    %98 = tpu.matmul %95, %13, %cst_20 {dimension_numbers = #tpu.dot_dimension_numbers<[1], [0], [0], [1], [0, 0, 1, 1], [], []>} : vector<8x128xf32>, vector<128x512xf32>, vector<8x512xf32> -> vector<8x512xf32>
    %99 = arith.addf %97, %98 : vector<8x512xf32>
    %100 = vector.extract_strided_slice %99 {offsets = [0, 0], sizes = [8, 384], strides = [1, 1]} : vector<8x512xf32> to vector<8x384xf32>
    %101 = arith.negf %100 : vector<8x384xf32>
    %102 = math.exp %101 : vector<8x384xf32>
    %cst_21 = arith.constant 1.000000e+00 : f32
    %103 = vector.broadcast %cst_21 : f32 to vector<8x384xf32>
    %104 = arith.addf %103, %102 : vector<8x384xf32>
    %105 = arith.divf %103, %104 : vector<8x384xf32>
    %106 = vector.extract_strided_slice %99 {offsets = [0, 384], sizes = [8, 128], strides = [1, 1]} : vector<8x512xf32> to vector<8x128xf32>
    %107 = math.tanh %106 : vector<8x128xf32>
    %108 = vector.extract_strided_slice %105 {offsets = [0, 0], sizes = [8, 128], strides = [1, 1]} : vector<8x384xf32> to vector<8x128xf32>
    %109 = vector.extract_strided_slice %105 {offsets = [0, 128], sizes = [8, 128], strides = [1, 1]} : vector<8x384xf32> to vector<8x128xf32>
    %110 = vector.extract_strided_slice %105 {offsets = [0, 256], sizes = [8, 128], strides = [1, 1]} : vector<8x384xf32> to vector<8x128xf32>
    %111 = arith.mulf %109, %93 : vector<8x128xf32>
    %112 = arith.mulf %108, %107 : vector<8x128xf32>
    %113 = arith.addf %111, %112 : vector<8x128xf32>
    %114 = math.tanh %113 : vector<8x128xf32>
    %115 = arith.mulf %110, %114 : vector<8x128xf32>
    %116 = vector.extract_strided_slice %12 {offsets = [5, 0, 0], sizes = [1, 8, 512], strides = [1, 1, 1]} : vector<8x8x512xf32> to vector<1x8x512xf32>
    %117 = vector.shape_cast %116 : vector<1x8x512xf32> to vector<8x512xf32>
    %cst_22 = arith.constant dense<0.000000e+00> : vector<8x512xf32>
    %118 = tpu.matmul %115, %13, %cst_22 {dimension_numbers = #tpu.dot_dimension_numbers<[1], [0], [0], [1], [0, 0, 1, 1], [], []>} : vector<8x128xf32>, vector<128x512xf32>, vector<8x512xf32> -> vector<8x512xf32>
    %119 = arith.addf %117, %118 : vector<8x512xf32>
    %120 = vector.extract_strided_slice %119 {offsets = [0, 0], sizes = [8, 384], strides = [1, 1]} : vector<8x512xf32> to vector<8x384xf32>
    %121 = arith.negf %120 : vector<8x384xf32>
    %122 = math.exp %121 : vector<8x384xf32>
    %cst_23 = arith.constant 1.000000e+00 : f32
    %123 = vector.broadcast %cst_23 : f32 to vector<8x384xf32>
    %124 = arith.addf %123, %122 : vector<8x384xf32>
    %125 = arith.divf %123, %124 : vector<8x384xf32>
    %126 = vector.extract_strided_slice %119 {offsets = [0, 384], sizes = [8, 128], strides = [1, 1]} : vector<8x512xf32> to vector<8x128xf32>
    %127 = math.tanh %126 : vector<8x128xf32>
    %128 = vector.extract_strided_slice %125 {offsets = [0, 0], sizes = [8, 128], strides = [1, 1]} : vector<8x384xf32> to vector<8x128xf32>
    %129 = vector.extract_strided_slice %125 {offsets = [0, 128], sizes = [8, 128], strides = [1, 1]} : vector<8x384xf32> to vector<8x128xf32>
    %130 = vector.extract_strided_slice %125 {offsets = [0, 256], sizes = [8, 128], strides = [1, 1]} : vector<8x384xf32> to vector<8x128xf32>
    %131 = arith.mulf %129, %113 : vector<8x128xf32>
    %132 = arith.mulf %128, %127 : vector<8x128xf32>
    %133 = arith.addf %131, %132 : vector<8x128xf32>
    %134 = math.tanh %133 : vector<8x128xf32>
    %135 = arith.mulf %130, %134 : vector<8x128xf32>
    %136 = vector.extract_strided_slice %12 {offsets = [6, 0, 0], sizes = [1, 8, 512], strides = [1, 1, 1]} : vector<8x8x512xf32> to vector<1x8x512xf32>
    %137 = vector.shape_cast %136 : vector<1x8x512xf32> to vector<8x512xf32>
    %cst_24 = arith.constant dense<0.000000e+00> : vector<8x512xf32>
    %138 = tpu.matmul %135, %13, %cst_24 {dimension_numbers = #tpu.dot_dimension_numbers<[1], [0], [0], [1], [0, 0, 1, 1], [], []>} : vector<8x128xf32>, vector<128x512xf32>, vector<8x512xf32> -> vector<8x512xf32>
    %139 = arith.addf %137, %138 : vector<8x512xf32>
    %140 = vector.extract_strided_slice %139 {offsets = [0, 0], sizes = [8, 384], strides = [1, 1]} : vector<8x512xf32> to vector<8x384xf32>
    %141 = arith.negf %140 : vector<8x384xf32>
    %142 = math.exp %141 : vector<8x384xf32>
    %cst_25 = arith.constant 1.000000e+00 : f32
    %143 = vector.broadcast %cst_25 : f32 to vector<8x384xf32>
    %144 = arith.addf %143, %142 : vector<8x384xf32>
    %145 = arith.divf %143, %144 : vector<8x384xf32>
    %146 = vector.extract_strided_slice %139 {offsets = [0, 384], sizes = [8, 128], strides = [1, 1]} : vector<8x512xf32> to vector<8x128xf32>
    %147 = math.tanh %146 : vector<8x128xf32>
    %148 = vector.extract_strided_slice %145 {offsets = [0, 0], sizes = [8, 128], strides = [1, 1]} : vector<8x384xf32> to vector<8x128xf32>
    %149 = vector.extract_strided_slice %145 {offsets = [0, 128], sizes = [8, 128], strides = [1, 1]} : vector<8x384xf32> to vector<8x128xf32>
    %150 = vector.extract_strided_slice %145 {offsets = [0, 256], sizes = [8, 128], strides = [1, 1]} : vector<8x384xf32> to vector<8x128xf32>
    %151 = arith.mulf %149, %133 : vector<8x128xf32>
    %152 = arith.mulf %148, %147 : vector<8x128xf32>
    %153 = arith.addf %151, %152 : vector<8x128xf32>
    %154 = math.tanh %153 : vector<8x128xf32>
    %155 = arith.mulf %150, %154 : vector<8x128xf32>
    %156 = vector.extract_strided_slice %12 {offsets = [7, 0, 0], sizes = [1, 8, 512], strides = [1, 1, 1]} : vector<8x8x512xf32> to vector<1x8x512xf32>
    %157 = vector.shape_cast %156 : vector<1x8x512xf32> to vector<8x512xf32>
    %cst_26 = arith.constant dense<0.000000e+00> : vector<8x512xf32>
    %158 = tpu.matmul %155, %13, %cst_26 {dimension_numbers = #tpu.dot_dimension_numbers<[1], [0], [0], [1], [0, 0, 1, 1], [], []>} : vector<8x128xf32>, vector<128x512xf32>, vector<8x512xf32> -> vector<8x512xf32>
    %159 = arith.addf %157, %158 : vector<8x512xf32>
    %160 = vector.extract_strided_slice %159 {offsets = [0, 0], sizes = [8, 384], strides = [1, 1]} : vector<8x512xf32> to vector<8x384xf32>
    %161 = arith.negf %160 : vector<8x384xf32>
    %162 = math.exp %161 : vector<8x384xf32>
    %cst_27 = arith.constant 1.000000e+00 : f32
    %163 = vector.broadcast %cst_27 : f32 to vector<8x384xf32>
    %164 = arith.addf %163, %162 : vector<8x384xf32>
    %165 = arith.divf %163, %164 : vector<8x384xf32>
    %166 = vector.extract_strided_slice %159 {offsets = [0, 384], sizes = [8, 128], strides = [1, 1]} : vector<8x512xf32> to vector<8x128xf32>
    %167 = math.tanh %166 : vector<8x128xf32>
    %168 = vector.extract_strided_slice %165 {offsets = [0, 0], sizes = [8, 128], strides = [1, 1]} : vector<8x384xf32> to vector<8x128xf32>
    %169 = vector.extract_strided_slice %165 {offsets = [0, 128], sizes = [8, 128], strides = [1, 1]} : vector<8x384xf32> to vector<8x128xf32>
    %170 = vector.extract_strided_slice %165 {offsets = [0, 256], sizes = [8, 128], strides = [1, 1]} : vector<8x384xf32> to vector<8x128xf32>
    %171 = arith.mulf %169, %153 : vector<8x128xf32>
    %172 = arith.mulf %168, %167 : vector<8x128xf32>
    %173 = arith.addf %171, %172 : vector<8x128xf32>
    %174 = math.tanh %173 : vector<8x128xf32>
    %175 = arith.mulf %170, %174 : vector<8x128xf32>
    %c0_28 = arith.constant 0 : index
    %c0_29 = arith.constant 0 : index
    %176 = vector.load %arg9[%c0_28, %c0_29] : memref<8x128xf32, #tpu.memory_space<vmem>>, vector<8x128xf32>
    tpu.vector_store %arg9[%c0_28, %c0_29], %175 {strides = array<i32>} : memref<8x128xf32, #tpu.memory_space<vmem>>, vector<8x128xf32>,
    %c0_30 = arith.constant 0 : index
    %c0_31 = arith.constant 0 : index
    %177 = vector.load %arg10[%c0_30, %c0_31] : memref<8x128xf32, #tpu.memory_space<vmem>>, vector<8x128xf32>
    tpu.vector_store %arg10[%c0_30, %c0_31], %173 {strides = array<i32>} : memref<8x128xf32, #tpu.memory_space<vmem>>, vector<8x128xf32>,
    %c0_i32_32 = arith.constant 0 : i32
    %178 = arith.cmpi eq, %arg1, %c0_i32_32 : i32
    %179 = arith.extui %178 : i1 to i32
    %c0_i32_33 = arith.constant 0 : i32
    %180 = arith.cmpi ne, %179, %c0_i32_33 : i32
    scf.if %180 {
      %c0_34 = arith.constant 0 : index
      %c0_35 = arith.constant 0 : index
      %181 = vector.load %arg6[%c0_34, %c0_35] : memref<128x128xf32, #tpu.memory_space<vmem>>, vector<128x128xf32>
      %cst_36 = arith.constant dense<0.000000e+00> : vector<8x128xf32>
      %182 = tpu.matmul %175, %181, %cst_36 {dimension_numbers = #tpu.dot_dimension_numbers<[1], [0], [0], [1], [0, 0, 1, 1], [], []>} : vector<8x128xf32>, vector<128x128xf32>, vector<8x128xf32> -> vector<8x128xf32>
      %c0_37 = arith.constant 0 : index
      %c0_38 = arith.constant 0 : index
      %183 = vector.load %arg7[%c0_37, %c0_38] : memref<1x128xf32, #tpu.memory_space<vmem>>, vector<1x128xf32>
      %184 = vector.broadcast %183 : vector<1x128xf32> to vector<8x128xf32>
      %185 = arith.addf %182, %184 : vector<8x128xf32>
      %c0_39 = arith.constant 0 : index
      %c0_40 = arith.constant 0 : index
      %186 = vector.load %arg8[%c0_39, %c0_40] : memref<8x128xf32, #tpu.memory_space<vmem>>, vector<8x128xf32>
      tpu.vector_store %arg8[%c0_39, %c0_40], %185 {strides = array<i32>} : memref<8x128xf32, #tpu.memory_space<vmem>>, vector<8x128xf32>,
    } else {
    }
    return
  }
  func.func @transform_0(%arg0: i32, %arg1: i32) -> (i32, i32, i32) {
    %c0_i32 = arith.constant 0 : i32
    %c0_i32_0 = arith.constant 0 : i32
    return %arg1, %arg0, %c0_i32 : i32, i32, i32
  }
  func.func @transform_1(%arg0: i32, %arg1: i32) -> (i32, i32) {
    %c0_i32 = arith.constant 0 : i32
    %c0_i32_0 = arith.constant 0 : i32
    %c0_i32_1 = arith.constant 0 : i32
    return %c0_i32, %c0_i32_0 : i32, i32
  }
  func.func @transform_2(%arg0: i32, %arg1: i32) -> (i32, i32) {
    %c0_i32 = arith.constant 0 : i32
    %c0_i32_0 = arith.constant 0 : i32
    %c0_i32_1 = arith.constant 0 : i32
    return %c0_i32, %c0_i32_0 : i32, i32
  }
  func.func @transform_3(%arg0: i32, %arg1: i32) -> (i32, i32) {
    %c0_i32 = arith.constant 0 : i32
    %c0_i32_0 = arith.constant 0 : i32
    %c0_i32_1 = arith.constant 0 : i32
    return %c0_i32, %c0_i32_0 : i32, i32
  }
  func.func @transform_4(%arg0: i32, %arg1: i32) -> (i32, i32) {
    %c0_i32 = arith.constant 0 : i32
    %c0_i32_0 = arith.constant 0 : i32
    %c0_i32_1 = arith.constant 0 : i32
    return %c0_i32, %c0_i32_0 : i32, i32
  }
  func.func @transform_5(%arg0: i32, %arg1: i32) -> (i32, i32) {
    %c0_i32 = arith.constant 0 : i32
    %c0_i32_0 = arith.constant 0 : i32
    %c0_i32_1 = arith.constant 0 : i32
    return %c0_i32, %c0_i32_0 : i32, i32
  }
  func.func @transform_6(%arg0: i32, %arg1: i32) -> (i32, i32) {
    %c0_i32 = arith.constant 0 : i32
    %c0_i32_0 = arith.constant 0 : i32
    return %arg0, %c0_i32 : i32, i32
  }
}

</mosaic_0001>

<bundles_post_ra>
// kernel: tpu_custom_call.1
= control target key start
LH: loop header
LB: loop body
LE: loop exit
PB: predicated region body
PF: predicated region fallthrough
CT: control target
= control target key end

     0   :  { %11 = vsyncpa [#allocation5], 0  ;;  %s2769_s0 = inlined_call_operand.vmem [shape: f32[8,8,1], index: 0, kind: input, shape index: {}]   ;;  %s2770_s1 = inlined_call_operand.vmem [shape: f32[1,512], index: 1, kind: input, shape index: {}]   ;;  %s2771_s2 = inlined_call_operand.hbm [shape: f32[128,512], index: 2, kind: input, shape index: {}]   ;;  %s2772_s3 = inlined_call_operand.vmem [shape: f32[1,512], index: 3, kind: input, shape index: {}]   ;;  %s2773_s4 = inlined_call_operand.hbm [shape: f32[128,128], index: 4, kind: input, shape index: {}]   ;;  %s2774_s5 = inlined_call_operand.vmem [shape: f32[1,128], index: 5, kind: input, shape index: {}]   ;;  %s2775_s6 = inlined_call_operand.hbm [shape: f32[8,128], index: 6, kind: output, shape index: {}]  }
   0x1   :  { %12 = vsyncpa [#allocation8], 0 }
   0x2   :  { %13 = vsyncpa [#allocation6], 0  ;;  %s22_s23 = sshll.u32 %s2771_s2, 4  ;;  %s1807_s24 = smov [#allocation4]   ;;  %s23_s23 = int_to_ptr.hbm [resolvable:$true] %s22_s23 }
   0x3   :  { %s24_s25 = sshll.u32 %s1807_s24, 4  ;;  %s37_s28 = sshll.u32 %s2773_s4, 4  ;;  %s25_s25 = int_to_ptr.vmem [resolvable:$true] %s24_s25  ;;  %s38_s28 = int_to_ptr.hbm [resolvable:$true] %s37_s28 }
   0x4   :  { %s1808_s29 = smov 512   ;;  %s1809_s30 = smov 32  }
   0x5   :  { %30 = dma.hbm_to_vmem [thread:$0]  %s23_s23, 8192, %s25_s25, [#allocation5], %s1808_s29, %s1808_s29, %s1809_s30  }
   0x6   :  { %s1810_s7 = smov [#allocation7]   ;;  %s1811_s9 = smov 128  }
   0x7   :  { %s39_s8 = sshll.u32 %s1810_s7, 4  ;;  %s1812_s10 = smov 8   ;;  %s40_s8 = int_to_ptr.vmem [resolvable:$true] %s39_s8 }
   0x8   :  { %45 = dma.hbm_to_vmem [thread:$0]  %s38_s28, 2048, %s40_s8, [#allocation8], %s1811_s9, %s1811_s9, %s1812_s10  }
   0x9   :  { %1801 = dma.done.wait [#allocation5], 8192  }
   0xa   :  { %1802 = vsyncadd [#allocation5], 4294959104 }
   0xb   :  { %1803 = dma.done.wait [#allocation8], 2048  }
   0xc   :  { %1804 = vsyncadd [#allocation8], 4294965248  ;;  %v1813_v0 = vmov 0   ;;  %v1857_v1 = vld [vmem:[#allocation4 + $0x1e0] sm:$0xff]  ;;  %v1859_v2 = vld [vmem:[#allocation4 + $0x1e8] sm:$0xff]  ;;  %s1815_s28 = smov [#allocation9]  }
   0xd   :  { %1533 = vset.pattern.permute.xlu0 %v1813_v0  ;;  %1534 = vset.pattern.permute.xlu1 %v1813_v0  ;;  %v1861_v3 = vld [vmem:[#allocation4 + $0x1f0] sm:$0xff]  ;;  %v1865_v4 = vld [vmem:[#allocation4 + $0x1f8] sm:$0xff]  ;;  %v1867_v5 = vld [vmem:[#allocation4 + $0x1c0] sm:$0xff]  ;;  %s1487_s29 = sshll.u32 %s1815_s28, 4  ;;  %s1489_s8 = sshll.u32 %s2775_s6, 4  ;;  %s1488_s29 = int_to_ptr.vmem [resolvable:$true] %s1487_s29  ;;  %s1490_s8 = int_to_ptr.hbm [resolvable:$true] %s1489_s8 }
   0xe   :  { %1535 = vset.pattern.permute.xlu2 %v1813_v0  ;;  %260 = vmatpush.msra.mxu0 %v1857_v1  ;;  %v1869_v6 = vld [vmem:[#allocation4 + $0x1c8] sm:$0xff]  ;;  %v1873_v7 = vld [vmem:[#allocation4 + $0x1d0] sm:$0xff]  ;;  %v1875_v8 = vld [vmem:[#allocation4 + $0x1d8] sm:$0xff] }
   0xf   :  { %280 = vmatpush.msra.mxu1 %v1859_v2  ;;  %300 = vmatpush.msra.mxu2 %v1861_v3  ;;  %v1877_v9 = vld [vmem:[#allocation4 + $0x1a0] sm:$0xff]  ;;  %v1881_v10 = vld [vmem:[#allocation4 + $0x1a8] sm:$0xff]  ;;  %v1883_v11 = vld [vmem:[#allocation4 + $0x1b0] sm:$0xff] }
  0x10   :  { %320 = vmatpush.msra.mxu3 %v1865_v4  ;;  %261 = vmatpush.msra.mxu0 %v1867_v5  ;;  %v1885_v12 = vld [vmem:[#allocation4 + $0x1b8] sm:$0xff]  ;;  %v1889_v13 = vld [vmem:[#allocation4 + $0x180] sm:$0xff]  ;;  %v1891_v14 = vld [vmem:[#allocation4 + $0x188] sm:$0xff] }
  0x11   :  { %281 = vmatpush.msra.mxu1 %v1869_v6  ;;  %301 = vmatpush.msra.mxu2 %v1873_v7  ;;  %v1895_v15 = vld [vmem:[#allocation4 + $0x190] sm:$0xff]  ;;  %v1897_v16 = vld [vmem:[#allocation4 + $0x198] sm:$0xff]  ;;  %v1901_v17 = vld [vmem:[#allocation4 + $0x160] sm:$0xff] }
  0x12   :  { %321 = vmatpush.msra.mxu3 %v1875_v8  ;;  %262 = vmatpush.msra.mxu0 %v1877_v9  ;;  %v1903_v18 = vld [vmem:[#allocation4 + $0x168] sm:$0xff]  ;;  %v1907_v19 = vld [vmem:[#allocation4 + $0x170] sm:$0xff]  ;;  %v1909_v20 = vld [vmem:[#allocation4 + $0x178] sm:$0xff] }
  0x13   :  { %282 = vmatpush.msra.mxu1 %v1881_v10  ;;  %302 = vmatpush.msra.mxu2 %v1883_v11  ;;  %v1913_v21 = vld [vmem:[#allocation4 + $0x140] sm:$0xff]  ;;  %v1915_v22 = vld [vmem:[#allocation4 + $0x148] sm:$0xff]  ;;  %v1919_v23 = vld [vmem:[#allocation4 + $0x150] sm:$0xff] }
  0x14   :  { %322 = vmatpush.msra.mxu3 %v1885_v12  ;;  %263 = vmatpush.msra.mxu0 %v1889_v13  ;;  %v1921_v24 = vld [vmem:[#allocation4 + $0x158] sm:$0xff]  ;;  %v1925_v25 = vld [vmem:[#allocation4 + $0x120] sm:$0xff]  ;;  %v1927_v26 = vld [vmem:[#allocation4 + $0x128] sm:$0xff] }
  0x15   :  { %283 = vmatpush.msra.mxu1 %v1891_v14  ;;  %303 = vmatpush.msra.mxu2 %v1895_v15  ;;  %v1931_v27 = vld [vmem:[#allocation4 + $0x130] sm:$0xff]  ;;  %v1933_v28 = vld [vmem:[#allocation4 + $0x138] sm:$0xff]  ;;  %v1937_v29 = vld [vmem:[#allocation4 + $0x100] sm:$0xff] }
  0x16   :  { %323 = vmatpush.msra.mxu3 %v1897_v16  ;;  %264 = vmatpush.msra.mxu0 %v1901_v17  ;;  %v1939_v30 = vld [vmem:[#allocation4 + $0x108] sm:$0xff]  ;;  %v1943_v31 = vld [vmem:[#allocation4 + $0x110] sm:$0xff]  ;;  %v1945_v32 = vld [vmem:[#allocation4 + $0x118] sm:$0xff] }
  0x17   :  { %284 = vmatpush.msra.mxu1 %v1903_v18  ;;  %304 = vmatpush.msra.mxu2 %v1907_v19  ;;  %v1949_v33 = vld [vmem:[#allocation4 + $0xe0] sm:$0xff]  ;;  %v1951_v34 = vld [vmem:[#allocation4 + $0xe8] sm:$0xff]  ;;  %v1955_v35 = vld [vmem:[#allocation4 + $0xf0] sm:$0xff] }
  0x18   :  { %324 = vmatpush.msra.mxu3 %v1909_v20  ;;  %265 = vmatpush.msra.mxu0 %v1913_v21  ;;  %v1957_v36 = vld [vmem:[#allocation4 + $0xf8] sm:$0xff]  ;;  %v1961_v37 = vld [vmem:[#allocation4 + $0xc0] sm:$0xff]  ;;  %v1963_v38 = vld [vmem:[#allocation4 + $0xc8] sm:$0xff] }
  0x19   :  { %285 = vmatpush.msra.mxu1 %v1915_v22  ;;  %305 = vmatpush.msra.mxu2 %v1919_v23  ;;  %v1967_v39 = vld [vmem:[#allocation4 + $0xd0] sm:$0xff]  ;;  %v1969_v40 = vld [vmem:[#allocation4 + $0xd8] sm:$0xff]  ;;  %v1973_v41 = vld [vmem:[#allocation4 + $0xa0] sm:$0xff] }
  0x1a   :  { %325 = vmatpush.msra.mxu3 %v1921_v24  ;;  %266 = vmatpush.msra.mxu0 %v1925_v25  ;;  %2907 = vst [vmem:[#allocation13_spill] sm:$0xff] %v1967_v39  ;;  %v1975_v42 = vld [vmem:[#allocation4 + $0xa8] sm:$0xff]  ;;  %v1979_v43 = vld [vmem:[#allocation4 + $0xb0] sm:$0xff]  ;;  %v1981_v44 = vld [vmem:[#allocation4 + $0xb8] sm:$0xff] }
  0x1b   :  { %286 = vmatpush.msra.mxu1 %v1927_v26  ;;  %306 = vmatpush.msra.mxu2 %v1931_v27  ;;  %2908 = vst [vmem:[#allocation14_spill] sm:$0xff] %v1969_v40  ;;  %v1985_v45 = vld [vmem:[#allocation4 + $0x80] sm:$0xff]  ;;  %v1987_v46 = vld [vmem:[#allocation4 + $0x88] sm:$0xff]  ;;  %v1991_v47 = vld [vmem:[#allocation4 + $0x90] sm:$0xff] }
  0x1c   :  { %326 = vmatpush.msra.mxu3 %v1933_v28  ;;  %267 = vmatpush.msra.mxu0 %v1937_v29  ;;  %2909 = vst [vmem:[#allocation15_spill] sm:$0xff] %v1973_v41  ;;  %v1993_v48 = vld [vmem:[#allocation4 + $0x98] sm:$0xff]  ;;  %v62_v49 = vld [vmem:[%s2769_s0] sm:$0xff]  ;;  %v2004_v51 = vld [vmem:[#allocation4 + $0x68] sm:$0xff] }
  0x1d   :  { %287 = vmatpush.msra.mxu1 %v1939_v30  ;;  %307 = vmatpush.msra.mxu2 %v1943_v31  ;;  %2910 = vst [vmem:[#allocation16_spill] sm:$0xff] %v1975_v42  ;;  %v2000_v50 = vld [vmem:[#allocation4 + $0x60] sm:$0xff]  ;;  %v2006_v52 = vld [vmem:[#allocation4 + $0x70] sm:$0xff]  ;;  %v2010_v53 = vld [vmem:[#allocation4 + $0x78] sm:$0xff] }
  0x1e   :  { %327 = vmatpush.msra.mxu3 %v1945_v32  ;;  %268 = vmatpush.msra.mxu0 %v1949_v33  ;;  %2911 = vst [vmem:[#allocation17_spill] sm:$0xff] %v1979_v43  ;;  %v2012_v54 = vld [vmem:[#allocation4 + $0x40] sm:$0xff]  ;;  %v2015_v55 = vld [vmem:[#allocation4 + $0x48] sm:$0xff]  ;;  %v2017_v56 = vld [vmem:[#allocation4 + $0x50] sm:$0xff] }
  0x1f   :  { %288 = vmatpush.msra.mxu1 %v1951_v34  ;;  %308 = vmatpush.msra.mxu2 %v1955_v35  ;;  %2912 = vst [vmem:[#allocation18_spill] sm:$0xff] %v1981_v44  ;;  %v2021_v57 = vld [vmem:[#allocation4 + $0x58] sm:$0xff]  ;;  %v2023_v58 = vld [vmem:[#allocation4 + $0x20] sm:$0xff]  ;;  %v2027_v59 = vld [vmem:[#allocation4 + $0x28] sm:$0xff] }
  0x20   :  { %328 = vmatpush.msra.mxu3 %v1957_v36  ;;  %269 = vmatpush.msra.mxu0 %v1961_v37  ;;  %2913 = vst [vmem:[#allocation19_spill] sm:$0xff] %v1985_v45  ;;  %v2029_v60 = vld [vmem:[#allocation4 + $0x30] sm:$0xff]  ;;  %v2033_v61 = vld [vmem:[#allocation4 + $0x38] sm:$0xff]  ;;  %v2035_v62 = vld [vmem:[#allocation4] sm:$0xff] }
  0x21   :  { %289 = vmatpush.msra.mxu1 %v1963_v38  ;;  %309 = vmatpush.msra.mxu2 %v1967_v39  ;;  %2914 = vst [vmem:[#allocation20_spill] sm:$0xff] %v1987_v46  ;;  %v2039_v63 = vld [vmem:[#allocation4 + $0x8] sm:$0xff]  ;;  %v2041_v0 = vld [vmem:[#allocation4 + $0x10] sm:$0xff] }
  0x22   :  { %329 = vmatpush.msra.mxu3 %v1969_v40  ;;  %270 = vmatpush.msra.mxu0 %v1973_v41  ;;  %2915 = vst [vmem:[#allocation21_spill] sm:$0xff] %v1991_v47 }
  0x23   :  { %290 = vmatpush.msra.mxu1 %v1975_v42  ;;  %2916 = vst [vmem:[#allocation22_spill] sm:$0xff] %v1993_v48  ;;  %310 = vmatpush.msra.mxu2 %v1979_v43 }
  0x24   :  { %330 = vmatpush.msra.mxu3 %v1981_v44  ;;  %2917 = vst [vmem:[#allocation23_spill] sm:$0xff] %v2000_v50  ;;  %271 = vmatpush.msra.mxu0 %v1985_v45 }
  0x25   :  { %291 = vmatpush.msra.mxu1 %v1987_v46  ;;  %2918 = vst [vmem:[#allocation24_spill] sm:$0xff] %v2004_v51  ;;  %311 = vmatpush.msra.mxu2 %v1991_v47 }
  0x26   :  { %2919 = vst [vmem:[#allocation25_spill] sm:$0xff] %v2006_v52  ;;  %331 = vmatpush.msra.mxu3 %v1993_v48  ;;  %74 = vperm.xlu0 %1533, %v62_v49   ;;  %v2045_v49 = vld [vmem:[#allocation4 + $0x18] sm:$0xff] }
  0x27   :  { %2920 = vst [vmem:[#allocation26_spill] sm:$0xff] %v2010_v53  ;;  %272 = vmatpush.msra.mxu0 %v2000_v50  ;;  %292 = vmatpush.msra.mxu1 %v2004_v51 }
  0x28   :  { %2921 = vst [vmem:[#allocation27_spill] sm:$0xff] %v2012_v54  ;;  %312 = vmatpush.msra.mxu2 %v2006_v52  ;;  %332 = vmatpush.msra.mxu3 %v2010_v53 }
  0x29   :  { %2922 = vst [vmem:[#allocation28_spill] sm:$0xff] %v2015_v55  ;;  %273 = vmatpush.msra.mxu0 %v2012_v54  ;;  %293 = vmatpush.msra.mxu1 %v2015_v55 }
  0x2a   :  { %2923 = vst [vmem:[#allocation29_spill] sm:$0xff] %v2017_v56  ;;  %313 = vmatpush.msra.mxu2 %v2017_v56  ;;  %333 = vmatpush.msra.mxu3 %v2021_v57  ;;  %v63_v56 = vld [vmem:[%s2769_s0 + $0x8] sm:$0xff] }
  0x2b   :  { %2924 = vst [vmem:[#allocation30_spill] sm:$0xff] %v2021_v57  ;;  %274 = vmatpush.msra.mxu0 %v2023_v58  ;;  %294 = vmatpush.msra.mxu1 %v2027_v59 }
  0x2c   :  { %2925 = vst [vmem:[#allocation31_spill] sm:$0xff] %v2023_v58  ;;  %314 = vmatpush.msra.mxu2 %v2029_v60  ;;  %334 = vmatpush.msra.mxu3 %v2033_v61 }
  0x2d   :  { %2926 = vst [vmem:[#allocation32_spill] sm:$0xff] %v2027_v59  ;;  %275 = vmatpush.msra.mxu0 %v2035_v62  ;;  %295 = vmatpush.msra.mxu1 %v2039_v63  ;;  %v1814_v59 = vmov 0.0  }
  0x2e   :  { %2927 = vst [vmem:[#allocation33_spill] sm:$0xff] %v2029_v60  ;;  %315 = vmatpush.msra.mxu2 %v2041_v0  ;;  %335 = vmatpush.msra.mxu3 %v2045_v49 }
  0x2f   :  { %2928 = vst [vmem:[#allocation34_spill] sm:$0xff] %v2033_v61  ;;  %79 = vperm.xlu0 %1533, %v63_v56   ;;  %276 = vmatmul.f32.vlgmr.msra.gmra.mxu0 %v1814_v59 }
  0x30   :  { %2929 = vst [vmem:[#allocation35_spill] sm:$0xff] %v2035_v62  ;;  %296 = vmatmul.f32.vlgmr.msra.gmra.mxu1 %v1814_v59  ;;  %316 = vmatmul.f32.vlgmr.msra.gmra.mxu2 %v1814_v59 }
  0x31   :  { %2930 = vst [vmem:[#allocation36_spill] sm:$0xff] %v2039_v63  ;;  %336 = vmatmul.f32.vlgmr.msra.gmra.mxu3 %v1814_v59  ;;  %407 = vmatpush.msrb.mxu0 %v1857_v1  ;;  %v2933_v56 = vld [vmem:[#allocation29_spill] sm:$0xff] }
  0x32   :  { %2931 = vst [vmem:[#allocation37_spill] sm:$0xff] %v2041_v0  ;;  %427 = vmatpush.msrb.mxu1 %v1859_v2  ;;  %447 = vmatpush.msrb.mxu2 %v1861_v3  ;;  %v68_v0 = vld [vmem:[%s2769_s0 + $0x30] sm:$0xff] }
  0x33   :  { %2932 = vst [vmem:[#allocation38_spill] sm:$0xff] %v2045_v49  ;;  %467 = vmatpush.msrb.mxu3 %v1865_v4  ;;  %408 = vmatpush.msrb.mxu0 %v1867_v5 }
  0x34   :  { %428 = vmatpush.msrb.mxu1 %v1869_v6  ;;  %448 = vmatpush.msrb.mxu2 %v1873_v7  ;;  %v2934_v59 = vld [vmem:[#allocation32_spill] sm:$0xff] }
  0x35   :  { %468 = vmatpush.msrb.mxu3 %v1875_v8  ;;  %409 = vmatpush.msrb.mxu0 %v1877_v9 }
  0x36   :  { %429 = vmatpush.msrb.mxu1 %v1881_v10  ;;  %449 = vmatpush.msrb.mxu2 %v1883_v11 }
  0x37   :  { %104 = vperm.xlu0 %1533, %v68_v0   ;;  %469 = vmatpush.msrb.mxu3 %v1885_v12 }
  0x38   :  { %410 = vmatpush.msrb.mxu0 %v1889_v13  ;;  %430 = vmatpush.msrb.mxu1 %v1891_v14 }
  0x39   :  { %450 = vmatpush.msrb.mxu2 %v1895_v15  ;;  %470 = vmatpush.msrb.mxu3 %v1897_v16  ;;  %v2935_v0 = vld [vmem:[#allocation37_spill] sm:$0xff] }
  0x3a   :  { %411 = vmatpush.msrb.mxu0 %v1901_v17  ;;  %431 = vmatpush.msrb.mxu1 %v1903_v18 }
  0x3b   :  { %451 = vmatpush.msrb.mxu2 %v1907_v19  ;;  %471 = vmatpush.msrb.mxu3 %v1909_v20 }
  0x3c   :  { %412 = vmatpush.msrb.mxu0 %v1913_v21  ;;  %432 = vmatpush.msrb.mxu1 %v1915_v22 }
  0x3d   :  { %452 = vmatpush.msrb.mxu2 %v1919_v23  ;;  %472 = vmatpush.msrb.mxu3 %v1921_v24 }
  0x3e   :  { %413 = vmatpush.msrb.mxu0 %v1925_v25  ;;  %433 = vmatpush.msrb.mxu1 %v1927_v26 }
  0x3f   :  { %453 = vmatpush.msrb.mxu2 %v1931_v27  ;;  %473 = vmatpush.msrb.mxu3 %v1933_v28 }
  0x40   :  { %414 = vmatpush.msrb.mxu0 %v1937_v29  ;;  %434 = vmatpush.msrb.mxu1 %v1939_v30 }
  0x41   :  { %454 = vmatpush.msrb.mxu2 %v1943_v31  ;;  %474 = vmatpush.msrb.mxu3 %v1945_v32 }
  0x42   :  { %415 = vmatpush.msrb.mxu0 %v1949_v33  ;;  %435 = vmatpush.msrb.mxu1 %v1951_v34 }
  0x43   :  { %455 = vmatpush.msrb.mxu2 %v1955_v35  ;;  %475 = vmatpush.msrb.mxu3 %v1957_v36 }
  0x44   :  { %416 = vmatpush.msrb.mxu0 %v1961_v37  ;;  %436 = vmatpush.msrb.mxu1 %v1963_v38 }
  0x45   :  { %456 = vmatpush.msrb.mxu2 %v1967_v39  ;;  %476 = vmatpush.msrb.mxu3 %v1969_v40 }
  0x46   :  { %417 = vmatpush.msrb.mxu0 %v1973_v41  ;;  %437 = vmatpush.msrb.mxu1 %v1975_v42 }
  0x47   :  { %457 = vmatpush.msrb.mxu2 %v1979_v43  ;;  %477 = vmatpush.msrb.mxu3 %v1981_v44 }
  0x48   :  { %418 = vmatpush.msrb.mxu0 %v1985_v45  ;;  %438 = vmatpush.msrb.mxu1 %v1987_v46 }
  0x49   :  { %458 = vmatpush.msrb.mxu2 %v1991_v47  ;;  %478 = vmatpush.msrb.mxu3 %v1993_v48 }
  0x4a   :  { %419 = vmatpush.msrb.mxu0 %v2000_v50  ;;  %439 = vmatpush.msrb.mxu1 %v2004_v51 }
  0x4b   :  { %459 = vmatpush.msrb.mxu2 %v2006_v52  ;;  %479 = vmatpush.msrb.mxu3 %v2010_v53 }
  0x4c   :  { %420 = vmatpush.msrb.mxu0 %v2012_v54  ;;  %440 = vmatpush.msrb.mxu1 %v2015_v55 }
  0x4d   :  { %460 = vmatpush.msrb.mxu2 %v2933_v56  ;;  %480 = vmatpush.msrb.mxu3 %v2021_v57 }
  0x4e   :  { %421 = vmatpush.msrb.mxu0 %v2023_v58  ;;  %441 = vmatpush.msrb.mxu1 %v2934_v59 }
  0x4f   :  { %461 = vmatpush.msrb.mxu2 %v2029_v60  ;;  %481 = vmatpush.msrb.mxu3 %v2033_v61 }
  0x50   :  { %422 = vmatpush.msrb.mxu0 %v2035_v62  ;;  %442 = vmatpush.msrb.mxu1 %v2039_v63 }
  0x51   :  { %462 = vmatpush.msrb.mxu2 %v2935_v0  ;;  %482 = vmatpush.msrb.mxu3 %v2045_v49 }
  0x52   :  { %554 = vmatpush.msra.mxu0 %v1857_v1  ;;  %574 = vmatpush.msra.mxu1 %v1859_v2 }
  0x53   :  { %594 = vmatpush.msra.mxu2 %v1861_v3  ;;  %614 = vmatpush.msra.mxu3 %v1865_v4 }
  0x54   :  { %555 = vmatpush.msra.mxu0 %v1867_v5  ;;  %575 = vmatpush.msra.mxu1 %v1869_v6 }
  0x55   :  { %595 = vmatpush.msra.mxu2 %v1873_v7  ;;  %615 = vmatpush.msra.mxu3 %v1875_v8 }
  0x56   :  { %556 = vmatpush.msra.mxu0 %v1877_v9  ;;  %576 = vmatpush.msra.mxu1 %v1881_v10 }
  0x57   :  { %596 = vmatpush.msra.mxu2 %v1883_v11  ;;  %616 = vmatpush.msra.mxu3 %v1885_v12 }
  0x58   :  { %557 = vmatpush.msra.mxu0 %v1889_v13  ;;  %577 = vmatpush.msra.mxu1 %v1891_v14 }
  0x59   :  { %597 = vmatpush.msra.mxu2 %v1895_v15  ;;  %617 = vmatpush.msra.mxu3 %v1897_v16 }
  0x5a   :  { %558 = vmatpush.msra.mxu0 %v1901_v17  ;;  %578 = vmatpush.msra.mxu1 %v1903_v18 }
  0x5b   :  { %598 = vmatpush.msra.mxu2 %v1907_v19  ;;  %618 = vmatpush.msra.mxu3 %v1909_v20 }
  0x5c   :  { %559 = vmatpush.msra.mxu0 %v1913_v21  ;;  %579 = vmatpush.msra.mxu1 %v1915_v22 }
  0x5d   :  { %599 = vmatpush.msra.mxu2 %v1919_v23  ;;  %619 = vmatpush.msra.mxu3 %v1921_v24 }
  0x5e   :  { %560 = vmatpush.msra.mxu0 %v1925_v25  ;;  %580 = vmatpush.msra.mxu1 %v1927_v26 }
  0x5f   :  { %600 = vmatpush.msra.mxu2 %v1931_v27  ;;  %620 = vmatpush.msra.mxu3 %v1933_v28 }
  0x60   :  { %561 = vmatpush.msra.mxu0 %v1937_v29  ;;  %581 = vmatpush.msra.mxu1 %v1939_v30 }
  0x61   :  { %601 = vmatpush.msra.mxu2 %v1943_v31  ;;  %621 = vmatpush.msra.mxu3 %v1945_v32 }
  0x62   :  { %562 = vmatpush.msra.mxu0 %v1949_v33  ;;  %582 = vmatpush.msra.mxu1 %v1951_v34 }
  0x63   :  { %602 = vmatpush.msra.mxu2 %v1955_v35  ;;  %622 = vmatpush.msra.mxu3 %v1957_v36 }
  0x64   :  { %563 = vmatpush.msra.mxu0 %v1961_v37  ;;  %583 = vmatpush.msra.mxu1 %v1963_v38 }
  0x65   :  { %603 = vmatpush.msra.mxu2 %v1967_v39  ;;  %623 = vmatpush.msra.mxu3 %v1969_v40 }
  0x66   :  { %564 = vmatpush.msra.mxu0 %v1973_v41  ;;  %584 = vmatpush.msra.mxu1 %v1975_v42 }
  0x67   :  { %604 = vmatpush.msra.mxu2 %v1979_v43  ;;  %624 = vmatpush.msra.mxu3 %v1981_v44 }
  0x68   :  { %565 = vmatpush.msra.mxu0 %v1985_v45  ;;  %585 = vmatpush.msra.mxu1 %v1987_v46 }
  0x69   :  { %605 = vmatpush.msra.mxu2 %v1991_v47  ;;  %625 = vmatpush.msra.mxu3 %v1993_v48 }
  0x6a   :  { %566 = vmatpush.msra.mxu0 %v2000_v50  ;;  %586 = vmatpush.msra.mxu1 %v2004_v51 }
  0x6b   :  { %606 = vmatpush.msra.mxu2 %v2006_v52  ;;  %626 = vmatpush.msra.mxu3 %v2010_v53 }
  0x6c   :  { %567 = vmatpush.msra.mxu0 %v2012_v54  ;;  %587 = vmatpush.msra.mxu1 %v2015_v55 }
  0x6d   :  { %607 = vmatpush.msra.mxu2 %v2933_v56  ;;  %627 = vmatpush.msra.mxu3 %v2021_v57  ;;  %v71_v57 = vld [vmem:[%s2770_s1] sm:$0xf] }
  0x6e   :  { %568 = vmatpush.msra.mxu0 %v2023_v58  ;;  %588 = vmatpush.msra.mxu1 %v2934_v59  ;;  %v2189_v56 = vperm.slane %v71_v57, 0  ;;  %v2191_v58 = vperm.slane %v71_v57, 1  ;;  %v2204_v54 = vperm.slane %v71_v57, 2 }
  0x6f   :  { %608 = vmatpush.msra.mxu2 %v2029_v60  ;;  %628 = vmatpush.msra.mxu3 %v2033_v61  ;;  %v70_v61 = vld [vmem:[%s2772_s3] sm:$0xf] }
  0x70   :  { %569 = vmatpush.msra.mxu0 %v2035_v62  ;;  %589 = vmatpush.msra.mxu1 %v2039_v63  ;;  %2936 = vst [vmem:[#allocation39_spill] sm:$0xff] %v2189_v56  ;;  %v2197_v63 = vperm.slane %v70_v61, 0  ;;  %v2207_v47 = vperm.slane %v70_v61, 2 }
  0x71   :  { %609 = vmatpush.msra.mxu2 %v2935_v0  ;;  %629 = vmatpush.msra.mxu3 %v2045_v49  ;;  %2937 = vst [vmem:[#allocation40_spill] sm:$0xff] %v2191_v58  ;;  %v2200_v49 = vperm.slane %v70_v61, 1 }
  0x72   :  { %2938 = vst [vmem:[#allocation41_spill] sm:$0xff] %v2197_v63 }
  0x73   :  { %2939 = vst [vmem:[#allocation42_spill] sm:$0xff] %v2200_v49 }
  0x74   :  { %2940 = vst [vmem:[#allocation43_spill] sm:$0xff] %v2204_v54 }
  0x75   :  { %2941 = vst [vmem:[#allocation44_spill] sm:$0xff] %v2207_v47 }
  0x98   :  { %v75_v60 = vpop.permute.xlu0 %74 }
  0x99   :  { %v121_v62 = vmul.f32 %v2189_v56, %v75_v60  ;;  %v122_v0 = vmul.f32 %v2191_v58, %v75_v60  ;;  %v123_v48 = vmul.f32 %v2204_v54, %v75_v60 }
  0x9b   :  { %v162_v59 = vadd.f32 %v2197_v63, %v121_v62  ;;  %v163_v55 = vadd.f32 %v2200_v49, %v122_v0  ;;  %v164_v58 = vadd.f32 %v2207_v47, %v123_v48  ;;  %v2210_v63 = vperm.slane %v71_v57, 3 }
  0x9d   :  { %2942 = vst [vmem:[#allocation45_spill] sm:$0xff] %v2210_v63 }
  0xac   :  { %v277_v53 = vpop.f32.mrf.mxu0 }
  0xad   :  { %v297_v52 = vpop.f32.mrf.mxu1  ;;  %v340_v51 = vadd.f32 %v277_v53, %v162_v59  ;;  %v124_v53 = vmul.f32 %v2210_v63, %v75_v60 }
  0xae   :  { %v341_v50 = vadd.f32 %v297_v52, %v163_v55  ;;  %v2213_v55 = vperm.slane %v70_v61, 3 }
  0xaf   :  { %v1500_v56 = vmul.f32 -1.442695, %v340_v51 }
  0xb0   :  { %v1501_v46 = vmul.f32 -1.442695, %v341_v50  ;;  %2943 = vst [vmem:[#allocation46_spill] sm:$0xff] %v2213_v55  ;;  %v165_v48 = vadd.f32 %v2213_v55, %v124_v53 }
  0xb1   :  { %1537 = vpow2.f32 %v1500_v56 }
  0xb2   :  { %1539 = vpow2.f32 %v1501_v46 }
  0xb3   :  { %v317_v45 = vpop.f32.mrf.mxu2 }
  0xb4   :  { %v342_v62 = vadd.f32 %v317_v45, %v164_v58  ;;  %v337_v50 = vpop.f32.mrf.mxu3 }
  0xb5   :  { %v343_v57 = vadd.f32 %v337_v50, %v165_v48 }
  0xb6   :  { %v1502_v0 = vmul.f32 -1.442695, %v342_v62 }
  0xb7   :  { %v1538_v49 = vpop.eup %1537 }
  0xb8   :  { %v1540_v44 = vpop.eup %1539  ;;  %v353_v43 = vadd.f32 1.0, %v1538_v49  ;;  %1541 = vpow2.f32 %v1502_v0 }
  0xb9   :  { %v354_v52 = vadd.f32 1.0, %v1540_v44 }
  0xba   :  { %1543 = vrcp.f32 %v353_v43  ;;  %v367_v44 = vand.u32 2147483648, %v353_v43  ;;  %v365_v61 = vand.u32 2147483647, %v353_v43  ;;  %vm361_vm2 = vweird.f32 %v353_v43 }
  0xbb   :  { %1545 = vrcp.f32 %v354_v52  ;;  %v382_v0 = vand.u32 2147483648, %v354_v52  ;;  %v380_v47 = vand.u32 2147483647, %v354_v52  ;;  %vm376_vm3 = vweird.f32 %v354_v52 }
  0xbc   :  { %vm366_vm5 = vcmp.eq.f32.partialorder %v365_v61, 8.507059e+37  ;;  %v2965_v61 = vld [vmem:[#allocation34_spill] sm:$0xff] }
  0xbd   :  { %v383_v55 = vor.u32 1.1754944e-38, %v382_v0  ;;  %vm381_vm7 = vcmp.eq.f32.partialorder %v380_v47, 8.507059e+37 }
  0xbe   :  { %v1542_v46 = vpop.eup %1541 }
  0xbf   :  { %v355_v51 = vadd.f32 1.0, %v1542_v46  ;;  %v368_v46 = vor.u32 1.1754944e-38, %v367_v44 }
  0xc0   :  { %v1544_v45 = vpop.eup %1543 }
  0xc1   :  { %v1546_v58 = vpop.eup %1545  ;;  %v357_v56 = vmul.f32 %v1544_v45, %v353_v43  ;;  %1547 = vrcp.f32 %v355_v51  ;;  %vm362_vm0 = vweird.f32 %v1544_v45  ;;  %vm391_vm9 = vweird.f32 %v355_v51 }
  0xc2   :  { %v372_v59 = vmul.f32 %v1546_v58, %v354_v52  ;;  %1549 = vtanh.f32 %v343_v57  ;;  %vm377_vm1 = vweird.f32 %v1546_v58  ;;  %vm363_vm4 = vmor %vm361_vm2, %vm362_vm0  ;;  %v395_v52 = vand.u32 2147483647, %v355_v51 }
  0xc3   :  { %v358_v49 = vsub.f32 1.0, %v357_v56  ;;  %vm378_vm6 = vmor %vm376_vm3, %vm377_vm1 }
  0xc4   :  { %v373_v62 = vsub.f32 1.0, %v372_v59  ;;  %vm396_vm11 = vcmp.eq.f32.partialorder %v395_v52, 8.507059e+37  ;;  %v2973_v52 = vld [vmem:[#allocation42_spill] sm:$0xff] }
  0xc5   :  { %v359_v60 = vmul.f32 %v1544_v45, %v358_v49 }
  0xc6   :  { %v374_v63 = vmul.f32 %v1546_v58, %v373_v62 }
  0xc7   :  { %v1548_v54 = vpop.eup %1547  ;;  %v360_v53 = vadd.f32 %v1544_v45, %v359_v60 }
  0xc8   :  { %v387_v50 = vmul.f32 %v1548_v54, %v355_v51  ;;  %v375_v48 = vadd.f32 %v1546_v58, %v374_v63  ;;  %v1550_v57 = vpop.eup %1549  ;;  %vm392_vm8 = vweird.f32 %v1548_v54  ;;  %v397_v63 = vand.u32 2147483648, %v355_v51  ;;  %v2964_v51 = vld [vmem:[#allocation33_spill] sm:$0xff] }
  0xc9   :  { %v364_v56 = vsel %vm363_vm4, %v1544_v45, %v360_v53  ;;  %vm393_vm10 = vmor %vm391_vm9, %vm392_vm8  ;;  %v2966_v53 = vld [vmem:[#allocation35_spill] sm:$0xff] }
  0xca   :  { %v388_v59 = vsub.f32 1.0, %v387_v50  ;;  %v369_v49 = vsel %vm366_vm5, %v368_v46, %v364_v56  ;;  %v379_v42 = vsel %vm378_vm6, %v1546_v58, %v375_v48  ;;  %v398_v44 = vor.u32 1.1754944e-38, %v397_v63  ;;  %v2967_v50 = vld [vmem:[#allocation36_spill] sm:$0xff]  ;;  %v2968_v46 = vld [vmem:[#allocation37_spill] sm:$0xff]  ;;  %v2969_v48 = vld [vmem:[#allocation38_spill] sm:$0xff]  ;;  %v80_v56 = vpop.permute.xlu0 %79 }
  0xcb   :  { %v384_v62 = vsel %vm381_vm7, %v383_v55, %v379_v42  ;;  %v403_v41 = vmul.f32 %v1550_v57, %v369_v49  ;;  %v2961_v42 = vld [vmem:[#allocation30_spill] sm:$0xff]  ;;  %v2963_v55 = vld [vmem:[#allocation32_spill] sm:$0xff]  ;;  %v2970_v57 = vld [vmem:[#allocation39_spill] sm:$0xff] }
  0xcc   :  { %v402_v40 = vmul.f32 0.0, %v384_v62  ;;  %v389_v39 = vmul.f32 %v1548_v54, %v388_v59  ;;  %v125_v59 = vmul.f32 %v2970_v57, %v80_v56  ;;  %v2971_v49 = vld [vmem:[#allocation40_spill] sm:$0xff] }
  0xcd   :  { %v126_v62 = vmul.f32 %v2971_v49, %v80_v56  ;;  %v2975_v49 = vld [vmem:[#allocation44_spill] sm:$0xff] }
  0xce   :  { %v2216_v60 = vadd.f32 %v403_v41, %v402_v40  ;;  %v390_v43 = vadd.f32 %v1548_v54, %v389_v39  ;;  %v2958_v39 = vld [vmem:[#allocation27_spill] sm:$0xff]  ;;  %v2959_v40 = vld [vmem:[#allocation28_spill] sm:$0xff]  ;;  %v2960_v41 = vld [vmem:[#allocation29_spill] sm:$0xff] }
  0xd0   :  { %1551 = vtanh.f32 %v2216_v60  ;;  %v394_v45 = vsel %vm393_vm10, %v1548_v54, %v390_v43  ;;  %v2962_v54 = vld [vmem:[#allocation31_spill] sm:$0xff]  ;;  %v2972_v43 = vld [vmem:[#allocation41_spill] sm:$0xff] }
  0xd1   :  { %v399_v58 = vsel %vm396_vm11, %v398_v44, %v394_v45  ;;  %v166_v63 = vadd.f32 %v2972_v43, %v125_v59  ;;  %v167_v45 = vadd.f32 %v2973_v52, %v126_v62  ;;  %v65_v62 = vld [vmem:[%s2769_s0 + $0x18] sm:$0xff] }
  0xd6   :  { %v1552_v0 = vpop.eup %1551 }
  0xd7   :  { %v406_v47 = vmul.f32 %v1552_v0, %v399_v58 }
  0xd9   :  { %423 = vmatmul.f32.vlgmr.msrb.gmra.mxu0 %v406_v47  ;;  %443 = vmatmul.f32.vlgmr.msrb.gmra.mxu1 %v406_v47 }
  0xda   :  { %463 = vmatmul.f32.vlgmr.msrb.gmra.mxu2 %v406_v47  ;;  %483 = vmatmul.f32.vlgmr.msrb.gmra.mxu3 %v406_v47 }
  0xdb   :  { %701 = vmatpush.msrb.mxu0 %v1857_v1  ;;  %721 = vmatpush.msrb.mxu1 %v1859_v2  ;;  %v2944_v1 = vld [vmem:[#allocation13_spill] sm:$0xff]  ;;  %v2945_v2 = vld [vmem:[#allocation14_spill] sm:$0xff] }
  0xdc   :  { %741 = vmatpush.msrb.mxu2 %v1861_v3  ;;  %761 = vmatpush.msrb.mxu3 %v1865_v4  ;;  %v2946_v3 = vld [vmem:[#allocation15_spill] sm:$0xff]  ;;  %v2947_v4 = vld [vmem:[#allocation16_spill] sm:$0xff] }
  0xdd   :  { %702 = vmatpush.msrb.mxu0 %v1867_v5  ;;  %722 = vmatpush.msrb.mxu1 %v1869_v6  ;;  %v2948_v5 = vld [vmem:[#allocation17_spill] sm:$0xff]  ;;  %v2949_v6 = vld [vmem:[#allocation18_spill] sm:$0xff] }
  0xde   :  { %742 = vmatpush.msrb.mxu2 %v1873_v7  ;;  %762 = vmatpush.msrb.mxu3 %v1875_v8  ;;  %v2950_v7 = vld [vmem:[#allocation19_spill] sm:$0xff]  ;;  %v2951_v8 = vld [vmem:[#allocation20_spill] sm:$0xff] }
  0xdf   :  { %703 = vmatpush.msrb.mxu0 %v1877_v9  ;;  %723 = vmatpush.msrb.mxu1 %v1881_v10  ;;  %v2952_v9 = vld [vmem:[#allocation21_spill] sm:$0xff]  ;;  %v2953_v10 = vld [vmem:[#allocation22_spill] sm:$0xff] }
  0xe0   :  { %743 = vmatpush.msrb.mxu2 %v1883_v11  ;;  %763 = vmatpush.msrb.mxu3 %v1885_v12  ;;  %v2954_v11 = vld [vmem:[#allocation23_spill] sm:$0xff]  ;;  %v2955_v12 = vld [vmem:[#allocation24_spill] sm:$0xff] }
  0xe1   :  { %704 = vmatpush.msrb.mxu0 %v1889_v13  ;;  %724 = vmatpush.msrb.mxu1 %v1891_v14  ;;  %v2956_v13 = vld [vmem:[#allocation25_spill] sm:$0xff]  ;;  %v2957_v14 = vld [vmem:[#allocation26_spill] sm:$0xff] }
  0xe2   :  { %744 = vmatpush.msrb.mxu2 %v1895_v15  ;;  %764 = vmatpush.msrb.mxu3 %v1897_v16 }
  0xe3   :  { %705 = vmatpush.msrb.mxu0 %v1901_v17  ;;  %725 = vmatpush.msrb.mxu1 %v1903_v18 }
  0xe4   :  { %745 = vmatpush.msrb.mxu2 %v1907_v19  ;;  %765 = vmatpush.msrb.mxu3 %v1909_v20 }
  0xe5   :  { %706 = vmatpush.msrb.mxu0 %v1913_v21  ;;  %726 = vmatpush.msrb.mxu1 %v1915_v22 }
  0xe6   :  { %746 = vmatpush.msrb.mxu2 %v1919_v23  ;;  %766 = vmatpush.msrb.mxu3 %v1921_v24 }
  0xe7   :  { %707 = vmatpush.msrb.mxu0 %v1925_v25  ;;  %727 = vmatpush.msrb.mxu1 %v1927_v26 }
  0xe8   :  { %747 = vmatpush.msrb.mxu2 %v1931_v27  ;;  %767 = vmatpush.msrb.mxu3 %v1933_v28 }
  0xe9   :  { %708 = vmatpush.msrb.mxu0 %v1937_v29  ;;  %728 = vmatpush.msrb.mxu1 %v1939_v30 }
  0xea   :  { %748 = vmatpush.msrb.mxu2 %v1943_v31  ;;  %768 = vmatpush.msrb.mxu3 %v1945_v32 }
  0xeb   :  { %709 = vmatpush.msrb.mxu0 %v1949_v33  ;;  %729 = vmatpush.msrb.mxu1 %v1951_v34 }
  0xec   :  { %749 = vmatpush.msrb.mxu2 %v1955_v35  ;;  %769 = vmatpush.msrb.mxu3 %v1957_v36 }
  0xed   :  { %710 = vmatpush.msrb.mxu0 %v1961_v37  ;;  %730 = vmatpush.msrb.mxu1 %v1963_v38 }
  0xee   :  { %750 = vmatpush.msrb.mxu2 %v2944_v1  ;;  %770 = vmatpush.msrb.mxu3 %v2945_v2 }
  0xef   :  { %711 = vmatpush.msrb.mxu0 %v2946_v3  ;;  %731 = vmatpush.msrb.mxu1 %v2947_v4 }
  0xf0   :  { %751 = vmatpush.msrb.mxu2 %v2948_v5  ;;  %771 = vmatpush.msrb.mxu3 %v2949_v6 }
  0xf1   :  { %712 = vmatpush.msrb.mxu0 %v2950_v7  ;;  %732 = vmatpush.msrb.mxu1 %v2951_v8 }
  0xf2   :  { %752 = vmatpush.msrb.mxu2 %v2952_v9  ;;  %772 = vmatpush.msrb.mxu3 %v2953_v10 }
  0xf3   :  { %713 = vmatpush.msrb.mxu0 %v2954_v11  ;;  %733 = vmatpush.msrb.mxu1 %v2955_v12 }
  0xf4   :  { %753 = vmatpush.msrb.mxu2 %v2956_v13  ;;  %773 = vmatpush.msrb.mxu3 %v2957_v14 }
  0xf5   :  { %714 = vmatpush.msrb.mxu0 %v2958_v39  ;;  %734 = vmatpush.msrb.mxu1 %v2959_v40 }
  0xf6   :  { %754 = vmatpush.msrb.mxu2 %v2960_v41  ;;  %774 = vmatpush.msrb.mxu3 %v2961_v42 }
  0xf7   :  { %715 = vmatpush.msrb.mxu0 %v2962_v54  ;;  %735 = vmatpush.msrb.mxu1 %v2963_v55 }
  0xf8   :  { %755 = vmatpush.msrb.mxu2 %v2964_v51  ;;  %775 = vmatpush.msrb.mxu3 %v2965_v61 }
  0xf9   :  { %716 = vmatpush.msrb.mxu0 %v2966_v53  ;;  %736 = vmatpush.msrb.mxu1 %v2967_v50  ;;  %v2974_v53 = vld [vmem:[#allocation43_spill] sm:$0xff] }
  0xfa   :  { %756 = vmatpush.msrb.mxu2 %v2968_v46  ;;  %776 = vmatpush.msrb.mxu3 %v2969_v48  ;;  %v127_v61 = vmul.f32 %v2974_v53, %v80_v56  ;;  %v64_v48 = vld [vmem:[%s2769_s0 + $0x10] sm:$0xff] }
  0xfb   :  { %84 = vperm.xlu1 %1534, %v64_v48  }
  0xfc   :  { %v168_v57 = vadd.f32 %v2975_v49, %v127_v61  ;;  %v69_v61 = vld [vmem:[%s2769_s0 + $0x38] sm:$0xff] }
 0x103   :  { %89 = vperm.xlu1 %1534, %v65_v62  }
 0x10b   :  { %109 = vperm.xlu1 %1534, %v69_v61  }
 0x156   :  { %v424_v44 = vpop.f32.mrf.mxu0  ;;  %v444_v0 = vpop.f32.mrf.mxu1 }
 0x157   :  { %v487_v58 = vadd.f32 %v424_v44, %v166_v63  ;;  %v488_v47 = vadd.f32 %v444_v0, %v167_v45 }
 0x159   :  { %v1503_v50 = vmul.f32 -1.442695, %v487_v58  ;;  %v1504_v51 = vmul.f32 -1.442695, %v488_v47  ;;  %v2976_v47 = vld [vmem:[#allocation45_spill] sm:$0xff] }
 0x15a   :  { %v128_v48 = vmul.f32 %v2976_v47, %v80_v56 }
 0x15b   :  { %1553 = vpow2.f32 %v1503_v50 }
 0x15c   :  { %1555 = vpow2.f32 %v1504_v51 }
 0x15d   :  { %v464_v59 = vpop.f32.mrf.mxu2  ;;  %v484_v51 = vpop.f32.mrf.mxu3 }
 0x15e   :  { %v489_v43 = vadd.f32 %v464_v59, %v168_v57  ;;  %v2977_v57 = vld [vmem:[#allocation46_spill] sm:$0xff] }
 0x15f   :  { %v169_v59 = vadd.f32 %v2977_v57, %v128_v48 }
 0x160   :  { %v1505_v63 = vmul.f32 -1.442695, %v489_v43 }
 0x161   :  { %v1554_v45 = vpop.eup %1553  ;;  %v490_v53 = vadd.f32 %v484_v51, %v169_v59 }
 0x162   :  { %v1556_v44 = vpop.eup %1555  ;;  %v500_v0 = vadd.f32 1.0, %v1554_v45  ;;  %1557 = vpow2.f32 %v1505_v63 }
 0x163   :  { %v501_v58 = vadd.f32 1.0, %v1556_v44 }
 0x164   :  { %1559 = vrcp.f32 %v500_v0  ;;  %v514_v56 = vand.u32 2147483648, %v500_v0  ;;  %v512_v55 = vand.u32 2147483647, %v500_v0  ;;  %vm508_vm14 = vweird.f32 %v500_v0 }
 0x165   :  { %1561 = vrcp.f32 %v501_v58  ;;  %v529_v47 = vand.u32 2147483648, %v501_v58  ;;  %v527_v42 = vand.u32 2147483647, %v501_v58  ;;  %vm523_vm15 = vweird.f32 %v501_v58 }
 0x166   :  { %v515_v61 = vor.u32 1.1754944e-38, %v514_v56  ;;  %vm513_vm2 = vcmp.eq.f32.partialorder %v512_v55, 8.507059e+37  ;;  %v2319_v56 = vld [vmem:[#allocation4 + $0x1c8] sm:$0xff] }
 0x167   :  { %vm528_vm3 = vcmp.eq.f32.partialorder %v527_v42, 8.507059e+37 }
 0x168   :  { %v1558_v50 = vpop.eup %1557 }
 0x169   :  { %v502_v49 = vadd.f32 1.0, %v1558_v50 }
 0x16a   :  { %v1560_v43 = vpop.eup %1559 }
 0x16b   :  { %v1562_v45 = vpop.eup %1561  ;;  %v504_v63 = vmul.f32 %v1560_v43, %v500_v0  ;;  %1563 = vrcp.f32 %v502_v49  ;;  %vm509_vm12 = vweird.f32 %v1560_v43  ;;  %vm538_vm5 = vweird.f32 %v502_v49 }
 0x16c   :  { %v519_v62 = vmul.f32 %v1562_v45, %v501_v58  ;;  %1565 = vtanh.f32 %v490_v53  ;;  %vm524_vm13 = vweird.f32 %v1562_v45  ;;  %vm510_vm0 = vmor %vm508_vm14, %vm509_vm12 }
 0x16d   :  { %v505_v44 = vsub.f32 1.0, %v504_v63  ;;  %vm525_vm1 = vmor %vm523_vm15, %vm524_vm13  ;;  %v530_v63 = vor.u32 1.1754944e-38, %v529_v47  ;;  %v542_v47 = vand.u32 2147483647, %v502_v49 }
 0x16e   :  { %v520_v52 = vsub.f32 1.0, %v519_v62 }
 0x16f   :  { %v506_v46 = vmul.f32 %v1560_v43, %v505_v44  ;;  %vm543_vm7 = vcmp.eq.f32.partialorder %v542_v47, 8.507059e+37 }
 0x170   :  { %v521_v54 = vmul.f32 %v1562_v45, %v520_v52 }
 0x171   :  { %v1564_v48 = vpop.eup %1563  ;;  %v507_v50 = vadd.f32 %v1560_v43, %v506_v46 }
 0x172   :  { %v534_v51 = vmul.f32 %v1564_v48, %v502_v49  ;;  %v522_v59 = vadd.f32 %v1562_v45, %v521_v54  ;;  %v1566_v53 = vpop.eup %1565  ;;  %vm539_vm4 = vweird.f32 %v1564_v48  ;;  %v544_v54 = vand.u32 2147483648, %v502_v49  ;;  %v2313_v49 = vld [vmem:[#allocation4 + $0x1f8] sm:$0xff] }
 0x173   :  { %v511_v62 = vsel %vm510_vm0, %v1560_v43, %v507_v50  ;;  %vm540_vm6 = vmor %vm538_vm5, %vm539_vm4  ;;  %v2325_v50 = vld [vmem:[#allocation4 + $0x1d8] sm:$0xff] }
 0x174   :  { %v535_v57 = vsub.f32 1.0, %v534_v51  ;;  %v516_v44 = vsel %vm513_vm2, %v515_v61, %v511_v62  ;;  %v526_v41 = vsel %vm525_vm1, %v1562_v45, %v522_v59  ;;  %v545_v43 = vor.u32 1.1754944e-38, %v544_v54  ;;  %v2328_v51 = vld [vmem:[#allocation4 + $0x1a0] sm:$0xff]  ;;  %v2331_v61 = vld [vmem:[#allocation4 + $0x1a8] sm:$0xff]  ;;  %v2334_v59 = vld [vmem:[#allocation4 + $0x1b0] sm:$0xff] }
 0x175   :  { %v531_v52 = vsel %vm528_vm3, %v530_v63, %v526_v41  ;;  %v550_v40 = vmul.f32 %v1566_v53, %v516_v44  ;;  %v2337_v63 = vld [vmem:[#allocation4 + $0x1b8] sm:$0xff]  ;;  %v2340_v62 = vld [vmem:[#allocation4 + $0x180] sm:$0xff]  ;;  %v2343_v53 = vld [vmem:[#allocation4 + $0x188] sm:$0xff] }
 0x176   :  { %v549_v39 = vmul.f32 %v531_v52, %v2216_v60  ;;  %v536_v46 = vmul.f32 %v1564_v48, %v535_v57  ;;  %v2304_v60 = vld [vmem:[#allocation4 + $0x1e0] sm:$0xff]  ;;  %v2996_v44 = vld [vmem:[#allocation45_spill] sm:$0xff]  ;;  %v2997_v54 = vld [vmem:[#allocation46_spill] sm:$0xff] }
 0x177   :  { %v2316_v57 = vld [vmem:[#allocation4 + $0x1c0] sm:$0xff] }
 0x178   :  { %v2301_v0 = vadd.f32 %v550_v40, %v549_v39  ;;  %v537_v58 = vadd.f32 %v1564_v48, %v536_v46  ;;  %v2307_v39 = vld [vmem:[#allocation4 + $0x1e8] sm:$0xff]  ;;  %v2310_v40 = vld [vmem:[#allocation4 + $0x1f0] sm:$0xff] }
 0x17a   :  { %1567 = vtanh.f32 %v2301_v0  ;;  %v541_v55 = vsel %vm540_vm6, %v1564_v48, %v537_v58  ;;  %v2322_v48 = vld [vmem:[#allocation4 + $0x1d0] sm:$0xff] }
 0x17b   :  { %v546_v42 = vsel %vm543_vm7, %v545_v43, %v541_v55 }
 0x180   :  { %v1568_v45 = vpop.eup %1567 }
 0x181   :  { %v553_v41 = vmul.f32 %v1568_v45, %v546_v42 }
 0x183   :  { %570 = vmatmul.f32.vlgmr.msra.gmra.mxu0 %v553_v41  ;;  %590 = vmatmul.f32.vlgmr.msra.gmra.mxu1 %v553_v41 }
 0x184   :  { %610 = vmatmul.f32.vlgmr.msra.gmra.mxu2 %v553_v41  ;;  %630 = vmatmul.f32.vlgmr.msra.gmra.mxu3 %v553_v41 }
 0x185   :  { %848 = vmatpush.msra.mxu0 %v2304_v60  ;;  %868 = vmatpush.msra.mxu1 %v2307_v39 }
 0x186   :  { %888 = vmatpush.msra.mxu2 %v2310_v40  ;;  %908 = vmatpush.msra.mxu3 %v2313_v49 }
 0x187   :  { %849 = vmatpush.msra.mxu0 %v2316_v57  ;;  %869 = vmatpush.msra.mxu1 %v2319_v56 }
 0x188   :  { %889 = vmatpush.msra.mxu2 %v2322_v48  ;;  %909 = vmatpush.msra.mxu3 %v2325_v50 }
 0x189   :  { %850 = vmatpush.msra.mxu0 %v2328_v51  ;;  %870 = vmatpush.msra.mxu1 %v2331_v61 }
 0x18a   :  { %890 = vmatpush.msra.mxu2 %v2334_v59  ;;  %910 = vmatpush.msra.mxu3 %v2337_v63 }
 0x18b   :  { %851 = vmatpush.msra.mxu0 %v2340_v62  ;;  %871 = vmatpush.msra.mxu1 %v2343_v53 }
 0x18c   :  { %891 = vmatpush.msra.mxu2 %v1895_v15  ;;  %911 = vmatpush.msra.mxu3 %v1897_v16  ;;  %v2978_v15 = vld [vmem:[#allocation27_spill] sm:$0xff]  ;;  %v2979_v16 = vld [vmem:[#allocation28_spill] sm:$0xff] }
 0x18d   :  { %852 = vmatpush.msra.mxu0 %v1901_v17  ;;  %872 = vmatpush.msra.mxu1 %v1903_v18  ;;  %v2980_v17 = vld [vmem:[#allocation29_spill] sm:$0xff]  ;;  %v2981_v18 = vld [vmem:[#allocation30_spill] sm:$0xff] }
 0x18e   :  { %892 = vmatpush.msra.mxu2 %v1907_v19  ;;  %912 = vmatpush.msra.mxu3 %v1909_v20  ;;  %v2982_v19 = vld [vmem:[#allocation31_spill] sm:$0xff]  ;;  %v2983_v20 = vld [vmem:[#allocation32_spill] sm:$0xff] }
 0x18f   :  { %853 = vmatpush.msra.mxu0 %v1913_v21  ;;  %873 = vmatpush.msra.mxu1 %v1915_v22  ;;  %v2984_v21 = vld [vmem:[#allocation33_spill] sm:$0xff]  ;;  %v2985_v22 = vld [vmem:[#allocation34_spill] sm:$0xff] }
 0x190   :  { %893 = vmatpush.msra.mxu2 %v1919_v23  ;;  %913 = vmatpush.msra.mxu3 %v1921_v24  ;;  %v2986_v23 = vld [vmem:[#allocation35_spill] sm:$0xff]  ;;  %v2987_v24 = vld [vmem:[#allocation36_spill] sm:$0xff] }
 0x191   :  { %854 = vmatpush.msra.mxu0 %v1925_v25  ;;  %874 = vmatpush.msra.mxu1 %v1927_v26  ;;  %v2988_v25 = vld [vmem:[#allocation37_spill] sm:$0xff]  ;;  %v2989_v26 = vld [vmem:[#allocation38_spill] sm:$0xff] }
 0x192   :  { %894 = vmatpush.msra.mxu2 %v1931_v27  ;;  %914 = vmatpush.msra.mxu3 %v1933_v28  ;;  %v85_v27 = vpop.permute.xlu1 %84  ;;  %v2990_v28 = vld [vmem:[#allocation39_spill] sm:$0xff] }
 0x193   :  { %855 = vmatpush.msra.mxu0 %v1937_v29  ;;  %875 = vmatpush.msra.mxu1 %v1939_v30  ;;  %v129_v29 = vmul.f32 %v2990_v28, %v85_v27  ;;  %v2991_v30 = vld [vmem:[#allocation40_spill] sm:$0xff]  ;;  %v132_v52 = vmul.f32 %v2996_v44, %v85_v27 }
 0x194   :  { %895 = vmatpush.msra.mxu2 %v1943_v31  ;;  %915 = vmatpush.msra.mxu3 %v1945_v32  ;;  %v130_v31 = vmul.f32 %v2991_v30, %v85_v27  ;;  %v2992_v32 = vld [vmem:[#allocation41_spill] sm:$0xff] }
 0x195   :  { %856 = vmatpush.msra.mxu0 %v1949_v33  ;;  %876 = vmatpush.msra.mxu1 %v1951_v34  ;;  %v170_v33 = vadd.f32 %v2992_v32, %v129_v29  ;;  %v2993_v34 = vld [vmem:[#allocation42_spill] sm:$0xff]  ;;  %v173_v47 = vadd.f32 %v2997_v54, %v132_v52 }
 0x196   :  { %896 = vmatpush.msra.mxu2 %v1955_v35  ;;  %916 = vmatpush.msra.mxu3 %v1957_v36  ;;  %v171_v35 = vadd.f32 %v2993_v34, %v130_v31 }
 0x197   :  { %857 = vmatpush.msra.mxu0 %v1961_v37  ;;  %877 = vmatpush.msra.mxu1 %v1963_v38 }
 0x198   :  { %897 = vmatpush.msra.mxu2 %v2944_v1  ;;  %917 = vmatpush.msra.mxu3 %v2945_v2  ;;  %v2994_v2 = vld [vmem:[#allocation43_spill] sm:$0xff] }
 0x199   :  { %858 = vmatpush.msra.mxu0 %v2946_v3  ;;  %878 = vmatpush.msra.mxu1 %v2947_v4  ;;  %v131_v3 = vmul.f32 %v2994_v2, %v85_v27 }
 0x19a   :  { %898 = vmatpush.msra.mxu2 %v2948_v5  ;;  %918 = vmatpush.msra.mxu3 %v2949_v6  ;;  %v2995_v6 = vld [vmem:[#allocation44_spill] sm:$0xff] }
 0x19b   :  { %859 = vmatpush.msra.mxu0 %v2950_v7  ;;  %879 = vmatpush.msra.mxu1 %v2951_v8  ;;  %v172_v7 = vadd.f32 %v2995_v6, %v131_v3 }
 0x19c   :  { %899 = vmatpush.msra.mxu2 %v2952_v9  ;;  %919 = vmatpush.msra.mxu3 %v2953_v10 }
 0x19d   :  { %860 = vmatpush.msra.mxu0 %v2954_v11  ;;  %880 = vmatpush.msra.mxu1 %v2955_v12 }
 0x19e   :  { %900 = vmatpush.msra.mxu2 %v2956_v13  ;;  %920 = vmatpush.msra.mxu3 %v2957_v14 }
 0x19f   :  { %861 = vmatpush.msra.mxu0 %v2978_v15  ;;  %881 = vmatpush.msra.mxu1 %v2979_v16 }
 0x1a0   :  { %901 = vmatpush.msra.mxu2 %v2980_v17  ;;  %921 = vmatpush.msra.mxu3 %v2981_v18 }
 0x1a1   :  { %862 = vmatpush.msra.mxu0 %v2982_v19  ;;  %882 = vmatpush.msra.mxu1 %v2983_v20 }
 0x1a2   :  { %902 = vmatpush.msra.mxu2 %v2984_v21  ;;  %922 = vmatpush.msra.mxu3 %v2985_v22 }
 0x1a3   :  { %863 = vmatpush.msra.mxu0 %v2986_v23  ;;  %883 = vmatpush.msra.mxu1 %v2987_v24 }
 0x1a4   :  { %903 = vmatpush.msra.mxu2 %v2988_v25  ;;  %923 = vmatpush.msra.mxu3 %v2989_v26 }
 0x200   :  { %v571_v36 = vpop.f32.mrf.mxu0  ;;  %v591_v37 = vpop.f32.mrf.mxu1 }
 0x201   :  { %v634_v38 = vadd.f32 %v571_v36, %v170_v33  ;;  %v635_v1 = vadd.f32 %v591_v37, %v171_v35 }
 0x203   :  { %v1506_v4 = vmul.f32 -1.442695, %v634_v38  ;;  %v1507_v5 = vmul.f32 -1.442695, %v635_v1 }
 0x205   :  { %1569 = vpow2.f32 %v1506_v4 }
 0x206   :  { %1571 = vpow2.f32 %v1507_v5 }
 0x207   :  { %v611_v8 = vpop.f32.mrf.mxu2  ;;  %v631_v46 = vpop.f32.mrf.mxu3 }
 0x208   :  { %v636_v9 = vadd.f32 %v611_v8, %v172_v7  ;;  %v637_v45 = vadd.f32 %v631_v46, %v173_v47  ;;  %v2425_v46 = vld [vmem:[#allocation4 + $0x198] sm:$0xff]  ;;  %v2431_v47 = vld [vmem:[#allocation4 + $0x168] sm:$0xff] }
 0x20a   :  { %v1508_v10 = vmul.f32 -1.442695, %v636_v9 }
 0x20b   :  { %v1570_v11 = vpop.eup %1569 }
 0x20c   :  { %v1572_v12 = vpop.eup %1571  ;;  %v647_v13 = vadd.f32 1.0, %v1570_v11  ;;  %1573 = vpow2.f32 %v1508_v10 }
 0x20d   :  { %v648_v14 = vadd.f32 1.0, %v1572_v12 }
 0x20e   :  { %1575 = vrcp.f32 %v647_v13  ;;  %v661_v18 = vand.u32 2147483648, %v647_v13  ;;  %v659_v21 = vand.u32 2147483647, %v647_v13  ;;  %vm655_vm10 = vweird.f32 %v647_v13 }
 0x20f   :  { %1577 = vrcp.f32 %v648_v14  ;;  %v676_v19 = vand.u32 2147483648, %v648_v14  ;;  %v674_v23 = vand.u32 2147483647, %v648_v14  ;;  %vm670_vm11 = vweird.f32 %v648_v14 }
 0x210   :  { %v662_v27 = vor.u32 1.1754944e-38, %v661_v18  ;;  %vm660_vm14 = vcmp.eq.f32.partialorder %v659_v21, 8.507059e+37  ;;  %v2458_v18 = vld [vmem:[#allocation4 + $0x130] sm:$0xff]  ;;  %v2467_v21 = vld [vmem:[#allocation4 + $0x108] sm:$0xff] }
 0x211   :  { %v677_v31 = vor.u32 1.1754944e-38, %v676_v19  ;;  %vm675_vm15 = vcmp.eq.f32.partialorder %v674_v23, 8.507059e+37  ;;  %v2461_v19 = vld [vmem:[#allocation4 + $0x138] sm:$0xff] }
 0x212   :  { %v1574_v58 = vpop.eup %1573  ;;  %v2473_v23 = vld [vmem:[#allocation4 + $0x118] sm:$0xff] }
 0x213   :  { %v649_v55 = vadd.f32 1.0, %v1574_v58  ;;  %v2428_v58 = vld [vmem:[#allocation4 + $0x160] sm:$0xff] }
 0x214   :  { %v1576_v43 = vpop.eup %1575 }
 0x215   :  { %v1578_v42 = vpop.eup %1577  ;;  %v651_v41 = vmul.f32 %v1576_v43, %v647_v13  ;;  %1579 = vrcp.f32 %v649_v55  ;;  %vm656_vm8 = vweird.f32 %v1576_v43  ;;  %v691_v9 = vand.u32 2147483648, %v649_v55 }
 0x216   :  { %v666_v15 = vmul.f32 %v1578_v42, %v648_v14  ;;  %1581 = vtanh.f32 %v637_v45  ;;  %vm671_vm9 = vweird.f32 %v1578_v42  ;;  %vm657_vm12 = vmor %vm655_vm10, %vm656_vm8  ;;  %vm685_vm1 = vweird.f32 %v649_v55  ;;  %v2440_v45 = vld [vmem:[#allocation4 + $0x140] sm:$0xff] }
 0x217   :  { %v652_v16 = vsub.f32 1.0, %v651_v41  ;;  %vm672_vm13 = vmor %vm670_vm11, %vm671_vm9  ;;  %v689_v10 = vand.u32 2147483647, %v649_v55  ;;  %v692_v12 = vor.u32 1.1754944e-38, %v691_v9  ;;  %v2446_v41 = vld [vmem:[#allocation4 + $0x150] sm:$0xff]  ;;  %v2524_v9 = vld [vmem:[#allocation4 + $0x60] sm:$0xff] }
 0x218   :  { %v667_v17 = vsub.f32 1.0, %v666_v15  ;;  %v2449_v15 = vld [vmem:[#allocation4 + $0x158] sm:$0xff]  ;;  %3008 = vst [vmem:[#allocation23_spill] sm:$0xff] %v2524_v9 }
 0x219   :  { %v653_v20 = vmul.f32 %v1576_v43, %v652_v16  ;;  %vm690_vm3 = vcmp.eq.f32.partialorder %v689_v10, 8.507059e+37  ;;  %v2452_v16 = vld [vmem:[#allocation4 + $0x120] sm:$0xff]  ;;  %v2527_v10 = vld [vmem:[#allocation4 + $0x68] sm:$0xff] }
 0x21a   :  { %v668_v22 = vmul.f32 %v1578_v42, %v667_v17  ;;  %v2455_v17 = vld [vmem:[#allocation4 + $0x128] sm:$0xff]  ;;  %3009 = vst [vmem:[#allocation24_spill] sm:$0xff] %v2527_v10 }
 0x21b   :  { %v1580_v24 = vpop.eup %1579  ;;  %v654_v25 = vadd.f32 %v1576_v43, %v653_v20  ;;  %v2464_v20 = vld [vmem:[#allocation4 + $0x100] sm:$0xff] }
 0x21c   :  { %v681_v26 = vmul.f32 %v1580_v24, %v649_v55  ;;  %v669_v29 = vadd.f32 %v1578_v42, %v668_v22  ;;  %v1582_v35 = vpop.eup %1581  ;;  %vm686_vm0 = vweird.f32 %v1580_v24  ;;  %v2434_v55 = vld [vmem:[#allocation4 + $0x170] sm:$0xff] }
 0x21d   :  { %v658_v33 = vsel %vm657_vm12, %v1576_v43, %v654_v25  ;;  %vm687_vm2 = vmor %vm685_vm1, %vm686_vm0  ;;  %v2437_v43 = vld [vmem:[#allocation4 + $0x178] sm:$0xff]  ;;  %v2470_v22 = vld [vmem:[#allocation4 + $0x110] sm:$0xff] }
 0x21e   :  { %v682_v36 = vsub.f32 1.0, %v681_v26  ;;  %v663_v37 = vsel %vm660_vm14, %v662_v27, %v658_v33  ;;  %v673_v38 = vsel %vm672_vm13, %v1578_v42, %v669_v29  ;;  %v2443_v42 = vld [vmem:[#allocation4 + $0x148] sm:$0xff]  ;;  %v2482_v26 = vld [vmem:[#allocation4 + $0xf0] sm:$0xff]  ;;  %v2485_v27 = vld [vmem:[#allocation4 + $0xf8] sm:$0xff] }
 0x21f   :  { %v678_v1 = vsel %vm675_vm15, %v677_v31, %v673_v38  ;;  %v697_v3 = vmul.f32 %v1582_v35, %v663_v37  ;;  %v2479_v25 = vld [vmem:[#allocation4 + $0xe8] sm:$0xff]  ;;  %v2488_v29 = vld [vmem:[#allocation4 + $0xc0] sm:$0xff]  ;;  %v2494_v33 = vld [vmem:[#allocation4 + $0xd0] sm:$0xff] }
 0x220   :  { %v696_v4 = vmul.f32 %v678_v1, %v2301_v0  ;;  %v683_v5 = vmul.f32 %v1580_v24, %v682_v36  ;;  %v2422_v0 = vld [vmem:[#allocation4 + $0x190] sm:$0xff]  ;;  %v2491_v31 = vld [vmem:[#allocation4 + $0xc8] sm:$0xff]  ;;  %2998 = vst [vmem:[#allocation13_spill] sm:$0xff] %v2494_v33  ;;  %v2497_v35 = vld [vmem:[#allocation4 + $0xd8] sm:$0xff] }
 0x221   :  { %2999 = vst [vmem:[#allocation14_spill] sm:$0xff] %v2497_v35  ;;  %v2500_v36 = vld [vmem:[#allocation4 + $0xa0] sm:$0xff]  ;;  %v2503_v37 = vld [vmem:[#allocation4 + $0xa8] sm:$0xff]  ;;  %v2506_v38 = vld [vmem:[#allocation4 + $0xb0] sm:$0xff] }
 0x222   :  { %v2405_v7 = vadd.f32 %v697_v3, %v696_v4  ;;  %v684_v8 = vadd.f32 %v1580_v24, %v683_v5  ;;  %3000 = vst [vmem:[#allocation15_spill] sm:$0xff] %v2500_v36  ;;  %v2509_v1 = vld [vmem:[#allocation4 + $0xb8] sm:$0xff]  ;;  %v2512_v3 = vld [vmem:[#allocation4 + $0x80] sm:$0xff]  ;;  %v2515_v4 = vld [vmem:[#allocation4 + $0x88] sm:$0xff] }
 0x223   :  { %3001 = vst [vmem:[#allocation16_spill] sm:$0xff] %v2503_v37  ;;  %v2518_v5 = vld [vmem:[#allocation4 + $0x90] sm:$0xff] }
 0x224   :  { %1583 = vtanh.f32 %v2405_v7  ;;  %v688_v11 = vsel %vm687_vm2, %v1580_v24, %v684_v8  ;;  %v2476_v24 = vld [vmem:[#allocation4 + $0xe0] sm:$0xff]  ;;  %3002 = vst [vmem:[#allocation17_spill] sm:$0xff] %v2506_v38  ;;  %v2521_v8 = vld [vmem:[#allocation4 + $0x98] sm:$0xff] }
 0x225   :  { %v693_v14 = vsel %vm690_vm3, %v692_v12, %v688_v11  ;;  %3003 = vst [vmem:[#allocation18_spill] sm:$0xff] %v2509_v1  ;;  %v2530_v11 = vld [vmem:[#allocation4 + $0x70] sm:$0xff]  ;;  %v2533_v12 = vld [vmem:[#allocation4 + $0x78] sm:$0xff] }
 0x226   :  { %3004 = vst [vmem:[#allocation19_spill] sm:$0xff] %v2512_v3 }
 0x227   :  { %3005 = vst [vmem:[#allocation20_spill] sm:$0xff] %v2515_v4 }
 0x228   :  { %3006 = vst [vmem:[#allocation21_spill] sm:$0xff] %v2518_v5 }
 0x229   :  { %3007 = vst [vmem:[#allocation22_spill] sm:$0xff] %v2521_v8 }
 0x22a   :  { %v1584_v13 = vpop.eup %1583  ;;  %3010 = vst [vmem:[#allocation25_spill] sm:$0xff] %v2530_v11 }
 0x22b   :  { %v700_v52 = vmul.f32 %v1584_v13, %v693_v14  ;;  %3011 = vst [vmem:[#allocation26_spill] sm:$0xff] %v2533_v12  ;;  %v2536_v13 = vld [vmem:[#allocation4 + $0x40] sm:$0xff]  ;;  %v2539_v14 = vld [vmem:[#allocation4 + $0x48] sm:$0xff] }
 0x22c   :  { %3012 = vst [vmem:[#allocation27_spill] sm:$0xff] %v2536_v13 }
 0x22d   :  { %717 = vmatmul.f32.vlgmr.msrb.gmra.mxu0 %v700_v52  ;;  %737 = vmatmul.f32.vlgmr.msrb.gmra.mxu1 %v700_v52  ;;  %3013 = vst [vmem:[#allocation28_spill] sm:$0xff] %v2539_v14 }
 0x22e   :  { %757 = vmatmul.f32.vlgmr.msrb.gmra.mxu2 %v700_v52  ;;  %777 = vmatmul.f32.vlgmr.msrb.gmra.mxu3 %v700_v52  ;;  %v2542_v52 = vld [vmem:[#allocation4 + $0x50] sm:$0xff] }
 0x22f   :  { %995 = vmatpush.msrb.mxu0 %v2304_v60  ;;  %1015 = vmatpush.msrb.mxu1 %v2307_v39  ;;  %3014 = vst [vmem:[#allocation29_spill] sm:$0xff] %v2542_v52 }
 0x230   :  { %1035 = vmatpush.msrb.mxu2 %v2310_v40  ;;  %1055 = vmatpush.msrb.mxu3 %v2313_v49 }
 0x231   :  { %996 = vmatpush.msrb.mxu0 %v2316_v57  ;;  %1016 = vmatpush.msrb.mxu1 %v2319_v56 }
 0x232   :  { %1036 = vmatpush.msrb.mxu2 %v2322_v48  ;;  %1056 = vmatpush.msrb.mxu3 %v2325_v50 }
 0x233   :  { %997 = vmatpush.msrb.mxu0 %v2328_v51  ;;  %1017 = vmatpush.msrb.mxu1 %v2331_v61 }
 0x234   :  { %1037 = vmatpush.msrb.mxu2 %v2334_v59  ;;  %1057 = vmatpush.msrb.mxu3 %v2337_v63 }
 0x235   :  { %998 = vmatpush.msrb.mxu0 %v2340_v62  ;;  %1018 = vmatpush.msrb.mxu1 %v2343_v53 }
 0x236   :  { %1038 = vmatpush.msrb.mxu2 %v2422_v0  ;;  %1058 = vmatpush.msrb.mxu3 %v2425_v46 }
 0x237   :  { %999 = vmatpush.msrb.mxu0 %v2428_v58  ;;  %1019 = vmatpush.msrb.mxu1 %v2431_v47 }
 0x238   :  { %1039 = vmatpush.msrb.mxu2 %v2434_v55  ;;  %1059 = vmatpush.msrb.mxu3 %v2437_v43 }
 0x239   :  { %1000 = vmatpush.msrb.mxu0 %v2440_v45  ;;  %1020 = vmatpush.msrb.mxu1 %v2443_v42 }
 0x23a   :  { %1040 = vmatpush.msrb.mxu2 %v2446_v41  ;;  %1060 = vmatpush.msrb.mxu3 %v2449_v15 }
 0x23b   :  { %1001 = vmatpush.msrb.mxu0 %v2452_v16  ;;  %1021 = vmatpush.msrb.mxu1 %v2455_v17 }
 0x23c   :  { %1041 = vmatpush.msrb.mxu2 %v2458_v18  ;;  %1061 = vmatpush.msrb.mxu3 %v2461_v19 }
 0x23d   :  { %1002 = vmatpush.msrb.mxu0 %v2464_v20  ;;  %1022 = vmatpush.msrb.mxu1 %v2467_v21 }
 0x23e   :  { %1042 = vmatpush.msrb.mxu2 %v2470_v22  ;;  %1062 = vmatpush.msrb.mxu3 %v2473_v23 }
 0x23f   :  { %1003 = vmatpush.msrb.mxu0 %v2476_v24  ;;  %1023 = vmatpush.msrb.mxu1 %v2479_v25 }
 0x240   :  { %1043 = vmatpush.msrb.mxu2 %v2482_v26  ;;  %1063 = vmatpush.msrb.mxu3 %v2485_v27 }
 0x241   :  { %1004 = vmatpush.msrb.mxu0 %v2488_v29  ;;  %1024 = vmatpush.msrb.mxu1 %v2491_v31 }
 0x242   :  { %1044 = vmatpush.msrb.mxu2 %v2494_v33  ;;  %1064 = vmatpush.msrb.mxu3 %v2497_v35 }
 0x243   :  { %1005 = vmatpush.msrb.mxu0 %v2500_v36  ;;  %1025 = vmatpush.msrb.mxu1 %v2503_v37 }
 0x244   :  { %1045 = vmatpush.msrb.mxu2 %v2506_v38  ;;  %1065 = vmatpush.msrb.mxu3 %v2509_v1 }
 0x245   :  { %1006 = vmatpush.msrb.mxu0 %v2512_v3  ;;  %1026 = vmatpush.msrb.mxu1 %v2515_v4 }
 0x246   :  { %1046 = vmatpush.msrb.mxu2 %v2518_v5  ;;  %1066 = vmatpush.msrb.mxu3 %v2521_v8 }
 0x247   :  { %1007 = vmatpush.msrb.mxu0 %v2524_v9  ;;  %1027 = vmatpush.msrb.mxu1 %v2527_v10  ;;  %v2545_v10 = vld [vmem:[#allocation4 + $0x58] sm:$0xff] }
 0x248   :  { %1047 = vmatpush.msrb.mxu2 %v2530_v11  ;;  %1067 = vmatpush.msrb.mxu3 %v2533_v12  ;;  %3015 = vst [vmem:[#allocation30_spill] sm:$0xff] %v2545_v10  ;;  %v2548_v11 = vld [vmem:[#allocation4 + $0x20] sm:$0xff]  ;;  %v2551_v12 = vld [vmem:[#allocation4 + $0x28] sm:$0xff] }
 0x249   :  { %1008 = vmatpush.msrb.mxu0 %v2536_v13  ;;  %1028 = vmatpush.msrb.mxu1 %v2539_v14  ;;  %3016 = vst [vmem:[#allocation31_spill] sm:$0xff] %v2548_v11  ;;  %v2554_v13 = vld [vmem:[#allocation4 + $0x30] sm:$0xff]  ;;  %v2557_v14 = vld [vmem:[#allocation4 + $0x38] sm:$0xff] }
 0x24a   :  { %1048 = vmatpush.msrb.mxu2 %v2542_v52  ;;  %1068 = vmatpush.msrb.mxu3 %v2545_v10  ;;  %3017 = vst [vmem:[#allocation32_spill] sm:$0xff] %v2551_v12  ;;  %v2560_v52 = vld [vmem:[#allocation4] sm:$0xff]  ;;  %v2563_v10 = vld [vmem:[#allocation4 + $0x8] sm:$0xff] }
 0x24b   :  { %1009 = vmatpush.msrb.mxu0 %v2548_v11  ;;  %1029 = vmatpush.msrb.mxu1 %v2551_v12  ;;  %3018 = vst [vmem:[#allocation33_spill] sm:$0xff] %v2554_v13  ;;  %v2566_v11 = vld [vmem:[#allocation4 + $0x10] sm:$0xff]  ;;  %v2569_v12 = vld [vmem:[#allocation4 + $0x18] sm:$0xff] }
 0x24c   :  { %1049 = vmatpush.msrb.mxu2 %v2554_v13  ;;  %3019 = vst [vmem:[#allocation34_spill] sm:$0xff] %v2557_v14  ;;  %1069 = vmatpush.msrb.mxu3 %v2557_v14  ;;  %v90_v13 = vpop.permute.xlu1 %89 }
 0x24d   :  { %3020 = vst [vmem:[#allocation35_spill] sm:$0xff] %v2560_v52  ;;  %1010 = vmatpush.msrb.mxu0 %v2560_v52  ;;  %1030 = vmatpush.msrb.mxu1 %v2563_v10  ;;  %v133_v9 = vmul.f32 %v2990_v28, %v90_v13  ;;  %v134_v14 = vmul.f32 %v2991_v30, %v90_v13 }
 0x24e   :  { %3021 = vst [vmem:[#allocation36_spill] sm:$0xff] %v2563_v10  ;;  %1050 = vmatpush.msrb.mxu2 %v2566_v11  ;;  %1070 = vmatpush.msrb.mxu3 %v2569_v12  ;;  %v135_v1 = vmul.f32 %v2994_v2, %v90_v13 }
 0x24f   :  { %3022 = vst [vmem:[#allocation37_spill] sm:$0xff] %v2566_v11  ;;  %v174_v8 = vadd.f32 %v2992_v32, %v133_v9  ;;  %v175_v52 = vadd.f32 %v2993_v34, %v134_v14 }
 0x250   :  { %3023 = vst [vmem:[#allocation38_spill] sm:$0xff] %v2569_v12  ;;  %v176_v12 = vadd.f32 %v2995_v6, %v135_v1 }
 0x2aa   :  { %v718_v5 = vpop.f32.mrf.mxu0  ;;  %v738_v4 = vpop.f32.mrf.mxu1 }
 0x2ab   :  { %v781_v10 = vadd.f32 %v718_v5, %v174_v8  ;;  %v782_v3 = vadd.f32 %v738_v4, %v175_v52  ;;  %v136_v5 = vmul.f32 %v2996_v44, %v90_v13  ;;  %v66_v4 = vld [vmem:[%s2769_s0 + $0x20] sm:$0xff] }
 0x2ac   :  { %94 = vperm.xlu2 %1535, %v66_v4  }
 0x2ad   :  { %v1509_v11 = vmul.f32 -1.442695, %v781_v10  ;;  %v1510_v38 = vmul.f32 -1.442695, %v782_v3  ;;  %v177_v1 = vadd.f32 %v2997_v54, %v136_v5 }
 0x2af   :  { %1585 = vpow2.f32 %v1509_v11 }
 0x2b0   :  { %1587 = vpow2.f32 %v1510_v38 }
 0x2b1   :  { %v758_v37 = vpop.f32.mrf.mxu2  ;;  %v778_v38 = vpop.f32.mrf.mxu3 }
 0x2b2   :  { %v783_v28 = vadd.f32 %v758_v37, %v176_v12  ;;  %v784_v8 = vadd.f32 %v778_v38, %v177_v1 }
 0x2b4   :  { %v1511_v36 = vmul.f32 -1.442695, %v783_v28 }
 0x2b5   :  { %v1586_v30 = vpop.eup %1585 }
 0x2b6   :  { %v1588_v35 = vpop.eup %1587  ;;  %v794_v9 = vadd.f32 1.0, %v1586_v30  ;;  %1589 = vpow2.f32 %v1511_v36  ;;  %v67_v30 = vld [vmem:[%s2769_s0 + $0x28] sm:$0xff] }
 0x2b7   :  { %v795_v14 = vadd.f32 1.0, %v1588_v35  ;;  %99 = vperm.xlu2 %1535, %v67_v30  }
 0x2b8   :  { %1591 = vrcp.f32 %v794_v9  ;;  %v808_v13 = vand.u32 2147483648, %v794_v9  ;;  %v806_v5 = vand.u32 2147483647, %v794_v9  ;;  %vm802_vm6 = vweird.f32 %v794_v9 }
 0x2b9   :  { %1593 = vrcp.f32 %v795_v14  ;;  %v823_v52 = vand.u32 2147483648, %v795_v14  ;;  %v821_v38 = vand.u32 2147483647, %v795_v14  ;;  %vm817_vm7 = vweird.f32 %v795_v14 }
 0x2ba   :  { %v809_v6 = vor.u32 1.1754944e-38, %v808_v13  ;;  %vm807_vm10 = vcmp.eq.f32.partialorder %v806_v5, 8.507059e+37  ;;  %v3030_v5 = vld [vmem:[#allocation19_spill] sm:$0xff] }
 0x2bb   :  { %v824_v30 = vor.u32 1.1754944e-38, %v823_v52  ;;  %vm822_vm11 = vcmp.eq.f32.partialorder %v821_v38, 8.507059e+37  ;;  %v3029_v52 = vld [vmem:[#allocation18_spill] sm:$0xff]  ;;  %v3032_v38 = vld [vmem:[#allocation21_spill] sm:$0xff] }
 0x2bc   :  { %v1590_v3 = vpop.eup %1589 }
 0x2bd   :  { %v796_v37 = vadd.f32 1.0, %v1590_v3 }
 0x2be   :  { %v1592_v28 = vpop.eup %1591 }
 0x2bf   :  { %v1594_v35 = vpop.eup %1593  ;;  %v798_v36 = vmul.f32 %v1592_v28, %v794_v9  ;;  %1595 = vrcp.f32 %v796_v37  ;;  %vm803_vm4 = vweird.f32 %v1592_v28  ;;  %v838_v13 = vand.u32 2147483648, %v796_v37 }
 0x2c0   :  { %v813_v10 = vmul.f32 %v1594_v35, %v795_v14  ;;  %1597 = vtanh.f32 %v784_v8  ;;  %vm818_vm5 = vweird.f32 %v1594_v35  ;;  %vm804_vm8 = vmor %vm802_vm6, %vm803_vm4  ;;  %vm832_vm13 = vweird.f32 %v796_v37 }
 0x2c1   :  { %v799_v11 = vsub.f32 1.0, %v798_v36  ;;  %vm819_vm9 = vmor %vm817_vm7, %vm818_vm5 }
 0x2c2   :  { %v814_v12 = vsub.f32 1.0, %v813_v10 }
 0x2c3   :  { %v800_v4 = vmul.f32 %v1592_v28, %v799_v11 }
 0x2c4   :  { %v815_v3 = vmul.f32 %v1594_v35, %v814_v12 }
 0x2c5   :  { %v1596_v1 = vpop.eup %1595  ;;  %v801_v54 = vadd.f32 %v1592_v28, %v800_v4 }
 0x2c6   :  { %v828_v44 = vmul.f32 %v1596_v1, %v796_v37  ;;  %v816_v2 = vadd.f32 %v1594_v35, %v815_v3  ;;  %v1598_v8 = vpop.eup %1597  ;;  %vm833_vm12 = vweird.f32 %v1596_v1  ;;  %v3031_v3 = vld [vmem:[#allocation20_spill] sm:$0xff] }
 0x2c7   :  { %v805_v36 = vsel %vm804_vm8, %v1592_v28, %v801_v54  ;;  %v836_v54 = vand.u32 2147483647, %v796_v37  ;;  %vm834_vm14 = vmor %vm832_vm13, %vm833_vm12  ;;  %v3027_v37 = vld [vmem:[#allocation16_spill] sm:$0xff] }
 0x2c8   :  { %v829_v10 = vsub.f32 1.0, %v828_v44  ;;  %v810_v11 = vsel %vm807_vm10, %v809_v6, %v805_v36  ;;  %v820_v34 = vsel %vm819_vm9, %v1594_v35, %v816_v2  ;;  %v839_v44 = vor.u32 1.1754944e-38, %v838_v13  ;;  %v3028_v35 = vld [vmem:[#allocation17_spill] sm:$0xff]  ;;  %v3035_v36 = vld [vmem:[#allocation24_spill] sm:$0xff]  ;;  %v3042_v13 = vld [vmem:[#allocation31_spill] sm:$0xff] }
 0x2c9   :  { %v825_v12 = vsel %vm822_vm11, %v824_v30, %v820_v34  ;;  %v844_v32 = vmul.f32 %v1598_v8, %v810_v11  ;;  %vm837_vm15 = vcmp.eq.f32.partialorder %v836_v54, 8.507059e+37  ;;  %v3034_v30 = vld [vmem:[#allocation23_spill] sm:$0xff]  ;;  %v3036_v8 = vld [vmem:[#allocation25_spill] sm:$0xff]  ;;  %v3043_v54 = vld [vmem:[#allocation32_spill] sm:$0xff] }
 0x2ca   :  { %v843_v33 = vmul.f32 %v825_v12, %v2405_v7  ;;  %v830_v4 = vmul.f32 %v1596_v1, %v829_v10  ;;  %v3025_v7 = vld [vmem:[#allocation14_spill] sm:$0xff]  ;;  %v3038_v11 = vld [vmem:[#allocation27_spill] sm:$0xff]  ;;  %v3039_v12 = vld [vmem:[#allocation28_spill] sm:$0xff] }
 0x2cb   :  { %v3037_v10 = vld [vmem:[#allocation26_spill] sm:$0xff] }
 0x2cc   :  { %v2587_v9 = vadd.f32 %v844_v32, %v843_v33  ;;  %v831_v14 = vadd.f32 %v1596_v1, %v830_v4  ;;  %v3024_v32 = vld [vmem:[#allocation13_spill] sm:$0xff]  ;;  %v3026_v33 = vld [vmem:[#allocation15_spill] sm:$0xff] }
 0x2cd   :  { %v3040_v4 = vld [vmem:[#allocation29_spill] sm:$0xff] }
 0x2ce   :  { %1599 = vtanh.f32 %v2587_v9  ;;  %v835_v28 = vsel %vm834_vm14, %v1596_v1, %v831_v14  ;;  %v3033_v1 = vld [vmem:[#allocation22_spill] sm:$0xff] }
 0x2cf   :  { %v840_v6 = vsel %vm837_vm15, %v839_v44, %v835_v28  ;;  %v3041_v14 = vld [vmem:[#allocation30_spill] sm:$0xff]  ;;  %v3044_v28 = vld [vmem:[#allocation33_spill] sm:$0xff] }
 0x2d0   :  { %v3045_v44 = vld [vmem:[#allocation34_spill] sm:$0xff] }
 0x2d4   :  { %v1600_v2 = vpop.eup %1599 }
 0x2d5   :  { %v847_v34 = vmul.f32 %v1600_v2, %v840_v6  ;;  %v3046_v2 = vld [vmem:[#allocation35_spill] sm:$0xff]  ;;  %v3047_v6 = vld [vmem:[#allocation36_spill] sm:$0xff] }
 0x2d7   :  { %864 = vmatmul.f32.vlgmr.msra.gmra.mxu0 %v847_v34  ;;  %884 = vmatmul.f32.vlgmr.msra.gmra.mxu1 %v847_v34 }
 0x2d8   :  { %904 = vmatmul.f32.vlgmr.msra.gmra.mxu2 %v847_v34  ;;  %924 = vmatmul.f32.vlgmr.msra.gmra.mxu3 %v847_v34  ;;  %v3048_v34 = vld [vmem:[#allocation37_spill] sm:$0xff] }
 0x2d9   :  { %1142 = vmatpush.msra.mxu0 %v2304_v60  ;;  %1162 = vmatpush.msra.mxu1 %v2307_v39 }
 0x2da   :  { %1182 = vmatpush.msra.mxu2 %v2310_v40  ;;  %1202 = vmatpush.msra.mxu3 %v2313_v49 }
 0x2db   :  { %1143 = vmatpush.msra.mxu0 %v2316_v57  ;;  %1163 = vmatpush.msra.mxu1 %v2319_v56 }
 0x2dc   :  { %1183 = vmatpush.msra.mxu2 %v2322_v48  ;;  %1203 = vmatpush.msra.mxu3 %v2325_v50 }
 0x2dd   :  { %1144 = vmatpush.msra.mxu0 %v2328_v51  ;;  %1164 = vmatpush.msra.mxu1 %v2331_v61 }
 0x2de   :  { %1184 = vmatpush.msra.mxu2 %v2334_v59  ;;  %1204 = vmatpush.msra.mxu3 %v2337_v63 }
 0x2df   :  { %1145 = vmatpush.msra.mxu0 %v2340_v62  ;;  %1165 = vmatpush.msra.mxu1 %v2343_v53 }
 0x2e0   :  { %1185 = vmatpush.msra.mxu2 %v2422_v0  ;;  %1205 = vmatpush.msra.mxu3 %v2425_v46 }
 0x2e1   :  { %1146 = vmatpush.msra.mxu0 %v2428_v58  ;;  %1166 = vmatpush.msra.mxu1 %v2431_v47 }
 0x2e2   :  { %1186 = vmatpush.msra.mxu2 %v2434_v55  ;;  %1206 = vmatpush.msra.mxu3 %v2437_v43 }
 0x2e3   :  { %1147 = vmatpush.msra.mxu0 %v2440_v45  ;;  %1167 = vmatpush.msra.mxu1 %v2443_v42 }
 0x2e4   :  { %1187 = vmatpush.msra.mxu2 %v2446_v41  ;;  %1207 = vmatpush.msra.mxu3 %v2449_v15 }
 0x2e5   :  { %1148 = vmatpush.msra.mxu0 %v2452_v16  ;;  %1168 = vmatpush.msra.mxu1 %v2455_v17 }
 0x2e6   :  { %1188 = vmatpush.msra.mxu2 %v2458_v18  ;;  %1208 = vmatpush.msra.mxu3 %v2461_v19 }
 0x2e7   :  { %1149 = vmatpush.msra.mxu0 %v2464_v20  ;;  %1169 = vmatpush.msra.mxu1 %v2467_v21 }
 0x2e8   :  { %1189 = vmatpush.msra.mxu2 %v2470_v22  ;;  %1209 = vmatpush.msra.mxu3 %v2473_v23 }
 0x2e9   :  { %1150 = vmatpush.msra.mxu0 %v2476_v24  ;;  %1170 = vmatpush.msra.mxu1 %v2479_v25 }
 0x2ea   :  { %1190 = vmatpush.msra.mxu2 %v2482_v26  ;;  %1210 = vmatpush.msra.mxu3 %v2485_v27 }
 0x2eb   :  { %1151 = vmatpush.msra.mxu0 %v2488_v29  ;;  %1171 = vmatpush.msra.mxu1 %v2491_v31 }
 0x2ec   :  { %1191 = vmatpush.msra.mxu2 %v3024_v32  ;;  %1211 = vmatpush.msra.mxu3 %v3025_v7 }
 0x2ed   :  { %1152 = vmatpush.msra.mxu0 %v3026_v33  ;;  %1172 = vmatpush.msra.mxu1 %v3027_v37 }
 0x2ee   :  { %1192 = vmatpush.msra.mxu2 %v3028_v35  ;;  %1212 = vmatpush.msra.mxu3 %v3029_v52 }
 0x2ef   :  { %1153 = vmatpush.msra.mxu0 %v3030_v5  ;;  %1173 = vmatpush.msra.mxu1 %v3031_v3 }
 0x2f0   :  { %1193 = vmatpush.msra.mxu2 %v3032_v38  ;;  %1213 = vmatpush.msra.mxu3 %v3033_v1 }
 0x2f1   :  { %1154 = vmatpush.msra.mxu0 %v3034_v30  ;;  %1174 = vmatpush.msra.mxu1 %v3035_v36 }
 0x2f2   :  { %1194 = vmatpush.msra.mxu2 %v3036_v8  ;;  %1214 = vmatpush.msra.mxu3 %v3037_v10 }
 0x2f3   :  { %1155 = vmatpush.msra.mxu0 %v3038_v11  ;;  %1175 = vmatpush.msra.mxu1 %v3039_v12  ;;  %v3049_v11 = vld [vmem:[#allocation38_spill] sm:$0xff] }
 0x2f4   :  { %1195 = vmatpush.msra.mxu2 %v3040_v4  ;;  %1215 = vmatpush.msra.mxu3 %v3041_v14  ;;  %v3050_v4 = vld [vmem:[#allocation39_spill] sm:$0xff]  ;;  %v3051_v14 = vld [vmem:[#allocation40_spill] sm:$0xff] }
 0x2f5   :  { %1156 = vmatpush.msra.mxu0 %v3042_v13  ;;  %1176 = vmatpush.msra.mxu1 %v3043_v54  ;;  %v3052_v13 = vld [vmem:[#allocation41_spill] sm:$0xff]  ;;  %v3053_v54 = vld [vmem:[#allocation42_spill] sm:$0xff] }
 0x2f6   :  { %1196 = vmatpush.msra.mxu2 %v3044_v28  ;;  %1216 = vmatpush.msra.mxu3 %v3045_v44 }
 0x2f7   :  { %1157 = vmatpush.msra.mxu0 %v3046_v2  ;;  %1177 = vmatpush.msra.mxu1 %v3047_v6  ;;  %v3054_v2 = vld [vmem:[#allocation43_spill] sm:$0xff] }
 0x2f8   :  { %1197 = vmatpush.msra.mxu2 %v3048_v34  ;;  %1217 = vmatpush.msra.mxu3 %v3049_v11  ;;  %v3055_v11 = vld [vmem:[#allocation44_spill] sm:$0xff] }
 0x306   :  { %v95_v12 = vpop.permute.xlu2 %94 }
 0x307   :  { %v137_v10 = vmul.f32 %v3050_v4, %v95_v12  ;;  %v138_v8 = vmul.f32 %v3051_v14, %v95_v12  ;;  %v139_v3 = vmul.f32 %v3054_v2, %v95_v12 }
 0x309   :  { %v178_v36 = vadd.f32 %v3052_v13, %v137_v10  ;;  %v179_v30 = vadd.f32 %v3053_v54, %v138_v8  ;;  %v180_v34 = vadd.f32 %v3055_v11, %v139_v3  ;;  %v3056_v54 = vld [vmem:[#allocation45_spill] sm:$0xff] }
 0x354   :  { %v865_v28 = vpop.f32.mrf.mxu0  ;;  %v885_v1 = vpop.f32.mrf.mxu1 }
 0x355   :  { %v928_v44 = vadd.f32 %v865_v28, %v178_v36  ;;  %v929_v38 = vadd.f32 %v885_v1, %v179_v30  ;;  %v140_v36 = vmul.f32 %v3056_v54, %v95_v12  ;;  %v3057_v28 = vld [vmem:[#allocation46_spill] sm:$0xff] }
 0x357   :  { %v1512_v6 = vmul.f32 -1.442695, %v928_v44  ;;  %v1513_v5 = vmul.f32 -1.442695, %v929_v38  ;;  %v181_v38 = vadd.f32 %v3057_v28, %v140_v36 }
 0x359   :  { %1601 = vpow2.f32 %v1512_v6 }
 0x35a   :  { %1603 = vpow2.f32 %v1513_v5 }
 0x35b   :  { %v905_v52 = vpop.f32.mrf.mxu2  ;;  %v925_v1 = vpop.f32.mrf.mxu3 }
 0x35c   :  { %v930_v4 = vadd.f32 %v905_v52, %v180_v34  ;;  %v931_v6 = vadd.f32 %v925_v1, %v181_v38 }
 0x35e   :  { %v1514_v35 = vmul.f32 -1.442695, %v930_v4 }
 0x35f   :  { %v1602_v14 = vpop.eup %1601 }
 0x360   :  { %v1604_v37 = vpop.eup %1603  ;;  %v941_v10 = vadd.f32 1.0, %v1602_v14  ;;  %1605 = vpow2.f32 %v1514_v35 }
 0x361   :  { %v942_v8 = vadd.f32 1.0, %v1604_v37 }
 0x362   :  { %1607 = vrcp.f32 %v941_v10  ;;  %v955_v14 = vand.u32 2147483648, %v941_v10  ;;  %v953_v12 = vand.u32 2147483647, %v941_v10  ;;  %vm949_vm2 = vweird.f32 %v941_v10 }
 0x363   :  { %1609 = vrcp.f32 %v942_v8  ;;  %v970_v37 = vand.u32 2147483648, %v942_v8  ;;  %v968_v2 = vand.u32 2147483647, %v942_v8  ;;  %vm964_vm3 = vweird.f32 %v942_v8 }
 0x364   :  { %vm954_vm6 = vcmp.eq.f32.partialorder %v953_v12, 8.507059e+37 }
 0x365   :  { %vm969_vm7 = vcmp.eq.f32.partialorder %v968_v2, 8.507059e+37 }
 0x366   :  { %v1606_v30 = vpop.eup %1605 }
 0x367   :  { %v943_v44 = vadd.f32 1.0, %v1606_v30  ;;  %v956_v30 = vor.u32 1.1754944e-38, %v955_v14 }
 0x368   :  { %v1608_v5 = vpop.eup %1607 }
 0x369   :  { %v1610_v3 = vpop.eup %1609  ;;  %v945_v11 = vmul.f32 %v1608_v5, %v941_v10  ;;  %1611 = vrcp.f32 %v943_v44  ;;  %vm950_vm0 = vweird.f32 %v1608_v5  ;;  %vm979_vm9 = vweird.f32 %v943_v44 }
 0x36a   :  { %v960_v52 = vmul.f32 %v1610_v3, %v942_v8  ;;  %1613 = vtanh.f32 %v931_v6  ;;  %vm965_vm1 = vweird.f32 %v1610_v3  ;;  %vm951_vm4 = vmor %vm949_vm2, %vm950_vm0 }
 0x36b   :  { %v946_v4 = vsub.f32 1.0, %v945_v11  ;;  %vm966_vm5 = vmor %vm964_vm3, %vm965_vm1  ;;  %v971_v11 = vor.u32 1.1754944e-38, %v970_v37 }
 0x36c   :  { %v961_v34 = vsub.f32 1.0, %v960_v52 }
 0x36d   :  { %v947_v35 = vmul.f32 %v1608_v5, %v946_v4 }
 0x36e   :  { %v962_v54 = vmul.f32 %v1610_v3, %v961_v34 }
 0x36f   :  { %v1612_v13 = vpop.eup %1611  ;;  %v948_v36 = vadd.f32 %v1608_v5, %v947_v35 }
 0x370   :  { %v975_v1 = vmul.f32 %v1612_v13, %v943_v44  ;;  %v963_v38 = vadd.f32 %v1610_v3, %v962_v54  ;;  %v1614_v6 = vpop.eup %1613  ;;  %vm980_vm8 = vweird.f32 %v1612_v13  ;;  %v985_v54 = vand.u32 2147483648, %v943_v44 }
 0x371   :  { %v952_v52 = vsel %vm951_vm4, %v1608_v5, %v948_v36  ;;  %v983_v5 = vand.u32 2147483647, %v943_v44  ;;  %vm981_vm10 = vmor %vm979_vm9, %vm980_vm8  ;;  %v3089_v44 = vld [vmem:[#allocation44_spill] sm:$0xff] }
 0x372   :  { %v976_v28 = vsub.f32 1.0, %v975_v1  ;;  %v957_v4 = vsel %vm954_vm6, %v956_v30, %v952_v52  ;;  %v967_v33 = vsel %vm966_vm5, %v1610_v3, %v963_v38  ;;  %v986_v37 = vor.u32 1.1754944e-38, %v985_v54  ;;  %v3091_v54 = vld [vmem:[#allocation46_spill] sm:$0xff] }
 0x373   :  { %v972_v34 = vsel %vm969_vm7, %v971_v11, %v967_v33  ;;  %v991_v7 = vmul.f32 %v1614_v6, %v957_v4  ;;  %vm984_vm11 = vcmp.eq.f32.partialorder %v983_v5, 8.507059e+37  ;;  %v3090_v4 = vld [vmem:[#allocation45_spill] sm:$0xff] }
 0x374   :  { %v990_v32 = vmul.f32 %v972_v34, %v2587_v9  ;;  %v977_v35 = vmul.f32 %v1612_v13, %v976_v28 }
 0x376   :  { %v2663_v10 = vadd.f32 %v991_v7, %v990_v32  ;;  %v978_v8 = vadd.f32 %v1612_v13, %v977_v35  ;;  %v3088_v32 = vld [vmem:[#allocation43_spill] sm:$0xff] }
 0x378   :  { %1615 = vtanh.f32 %v2663_v10  ;;  %v982_v14 = vsel %vm981_vm10, %v1612_v13, %v978_v8 }
 0x379   :  { %v987_v2 = vsel %vm984_vm11, %v986_v37, %v982_v14 }
 0x37e   :  { %v1616_v3 = vpop.eup %1615 }
 0x37f   :  { %v994_v33 = vmul.f32 %v1616_v3, %v987_v2 }
 0x381   :  { %1011 = vmatmul.f32.vlgmr.msrb.gmra.mxu0 %v994_v33  ;;  %1031 = vmatmul.f32.vlgmr.msrb.gmra.mxu1 %v994_v33 }
 0x382   :  { %1051 = vmatmul.f32.vlgmr.msrb.gmra.mxu2 %v994_v33  ;;  %1071 = vmatmul.f32.vlgmr.msrb.gmra.mxu3 %v994_v33 }
 0x383   :  { %1289 = vmatpush.msrb.mxu0 %v2304_v60  ;;  %1309 = vmatpush.msrb.mxu1 %v2307_v39  ;;  %v3058_v60 = vld [vmem:[#allocation13_spill] sm:$0xff]  ;;  %v3059_v39 = vld [vmem:[#allocation14_spill] sm:$0xff] }
 0x384   :  { %1329 = vmatpush.msrb.mxu2 %v2310_v40  ;;  %1349 = vmatpush.msrb.mxu3 %v2313_v49  ;;  %v3060_v40 = vld [vmem:[#allocation15_spill] sm:$0xff]  ;;  %v3061_v49 = vld [vmem:[#allocation16_spill] sm:$0xff] }
 0x385   :  { %1290 = vmatpush.msrb.mxu0 %v2316_v57  ;;  %1310 = vmatpush.msrb.mxu1 %v2319_v56  ;;  %v3062_v57 = vld [vmem:[#allocation17_spill] sm:$0xff]  ;;  %v3063_v56 = vld [vmem:[#allocation18_spill] sm:$0xff] }
 0x386   :  { %1330 = vmatpush.msrb.mxu2 %v2322_v48  ;;  %1350 = vmatpush.msrb.mxu3 %v2325_v50  ;;  %v3064_v48 = vld [vmem:[#allocation19_spill] sm:$0xff]  ;;  %v3065_v50 = vld [vmem:[#allocation20_spill] sm:$0xff] }
 0x387   :  { %1291 = vmatpush.msrb.mxu0 %v2328_v51  ;;  %1311 = vmatpush.msrb.mxu1 %v2331_v61  ;;  %v3066_v51 = vld [vmem:[#allocation21_spill] sm:$0xff]  ;;  %v3067_v61 = vld [vmem:[#allocation22_spill] sm:$0xff] }
 0x388   :  { %1331 = vmatpush.msrb.mxu2 %v2334_v59  ;;  %1351 = vmatpush.msrb.mxu3 %v2337_v63  ;;  %v3068_v59 = vld [vmem:[#allocation23_spill] sm:$0xff]  ;;  %v3069_v63 = vld [vmem:[#allocation24_spill] sm:$0xff] }
 0x389   :  { %1292 = vmatpush.msrb.mxu0 %v2340_v62  ;;  %1312 = vmatpush.msrb.mxu1 %v2343_v53  ;;  %v3070_v62 = vld [vmem:[#allocation25_spill] sm:$0xff]  ;;  %v3071_v53 = vld [vmem:[#allocation26_spill] sm:$0xff] }
 0x38a   :  { %1332 = vmatpush.msrb.mxu2 %v2422_v0  ;;  %1352 = vmatpush.msrb.mxu3 %v2425_v46  ;;  %v3072_v0 = vld [vmem:[#allocation27_spill] sm:$0xff]  ;;  %v3073_v46 = vld [vmem:[#allocation28_spill] sm:$0xff] }
 0x38b   :  { %1293 = vmatpush.msrb.mxu0 %v2428_v58  ;;  %1313 = vmatpush.msrb.mxu1 %v2431_v47  ;;  %v3074_v58 = vld [vmem:[#allocation29_spill] sm:$0xff]  ;;  %v3075_v47 = vld [vmem:[#allocation30_spill] sm:$0xff] }
 0x38c   :  { %1333 = vmatpush.msrb.mxu2 %v2434_v55  ;;  %1353 = vmatpush.msrb.mxu3 %v2437_v43  ;;  %v3076_v55 = vld [vmem:[#allocation31_spill] sm:$0xff]  ;;  %v3077_v43 = vld [vmem:[#allocation32_spill] sm:$0xff] }
 0x38d   :  { %1294 = vmatpush.msrb.mxu0 %v2440_v45  ;;  %1314 = vmatpush.msrb.mxu1 %v2443_v42  ;;  %v3078_v45 = vld [vmem:[#allocation33_spill] sm:$0xff]  ;;  %v3079_v42 = vld [vmem:[#allocation34_spill] sm:$0xff] }
 0x38e   :  { %1334 = vmatpush.msrb.mxu2 %v2446_v41  ;;  %1354 = vmatpush.msrb.mxu3 %v2449_v15  ;;  %v3080_v41 = vld [vmem:[#allocation35_spill] sm:$0xff]  ;;  %v3081_v15 = vld [vmem:[#allocation36_spill] sm:$0xff] }
 0x38f   :  { %1295 = vmatpush.msrb.mxu0 %v2452_v16  ;;  %1315 = vmatpush.msrb.mxu1 %v2455_v17  ;;  %v3082_v16 = vld [vmem:[#allocation37_spill] sm:$0xff]  ;;  %v3083_v17 = vld [vmem:[#allocation38_spill] sm:$0xff] }
 0x390   :  { %1335 = vmatpush.msrb.mxu2 %v2458_v18  ;;  %1355 = vmatpush.msrb.mxu3 %v2461_v19  ;;  %v100_v18 = vpop.permute.xlu2 %99  ;;  %v3084_v19 = vld [vmem:[#allocation39_spill] sm:$0xff] }
 0x391   :  { %1296 = vmatpush.msrb.mxu0 %v2464_v20  ;;  %1316 = vmatpush.msrb.mxu1 %v2467_v21  ;;  %v141_v20 = vmul.f32 %v3084_v19, %v100_v18  ;;  %v3085_v21 = vld [vmem:[#allocation40_spill] sm:$0xff]  ;;  %v143_v7 = vmul.f32 %v3088_v32, %v100_v18  ;;  %v144_v34 = vmul.f32 %v3090_v4, %v100_v18 }
 0x392   :  { %1336 = vmatpush.msrb.mxu2 %v2470_v22  ;;  %1356 = vmatpush.msrb.mxu3 %v2473_v23  ;;  %v142_v22 = vmul.f32 %v3085_v21, %v100_v18  ;;  %v3086_v23 = vld [vmem:[#allocation41_spill] sm:$0xff] }
 0x393   :  { %1297 = vmatpush.msrb.mxu0 %v2476_v24  ;;  %1317 = vmatpush.msrb.mxu1 %v2479_v25  ;;  %v182_v24 = vadd.f32 %v3086_v23, %v141_v20  ;;  %v3087_v25 = vld [vmem:[#allocation42_spill] sm:$0xff]  ;;  %v184_v12 = vadd.f32 %v3089_v44, %v143_v7  ;;  %v185_v5 = vadd.f32 %v3091_v54, %v144_v34 }
 0x394   :  { %1337 = vmatpush.msrb.mxu2 %v2482_v26  ;;  %1357 = vmatpush.msrb.mxu3 %v2485_v27  ;;  %v183_v26 = vadd.f32 %v3087_v25, %v142_v22 }
 0x395   :  { %1298 = vmatpush.msrb.mxu0 %v2488_v29  ;;  %1318 = vmatpush.msrb.mxu1 %v2491_v31 }
 0x396   :  { %1338 = vmatpush.msrb.mxu2 %v3058_v60  ;;  %1358 = vmatpush.msrb.mxu3 %v3059_v39 }
 0x397   :  { %1299 = vmatpush.msrb.mxu0 %v3060_v40  ;;  %1319 = vmatpush.msrb.mxu1 %v3061_v49 }
 0x398   :  { %1339 = vmatpush.msrb.mxu2 %v3062_v57  ;;  %1359 = vmatpush.msrb.mxu3 %v3063_v56 }
 0x399   :  { %1300 = vmatpush.msrb.mxu0 %v3064_v48  ;;  %1320 = vmatpush.msrb.mxu1 %v3065_v50 }
 0x39a   :  { %1340 = vmatpush.msrb.mxu2 %v3066_v51  ;;  %1360 = vmatpush.msrb.mxu3 %v3067_v61 }
 0x39b   :  { %1301 = vmatpush.msrb.mxu0 %v3068_v59  ;;  %1321 = vmatpush.msrb.mxu1 %v3069_v63 }
 0x39c   :  { %1341 = vmatpush.msrb.mxu2 %v3070_v62  ;;  %1361 = vmatpush.msrb.mxu3 %v3071_v53 }
 0x39d   :  { %1302 = vmatpush.msrb.mxu0 %v3072_v0  ;;  %1322 = vmatpush.msrb.mxu1 %v3073_v46 }
 0x39e   :  { %1342 = vmatpush.msrb.mxu2 %v3074_v58  ;;  %1362 = vmatpush.msrb.mxu3 %v3075_v47 }
 0x39f   :  { %1303 = vmatpush.msrb.mxu0 %v3076_v55  ;;  %1323 = vmatpush.msrb.mxu1 %v3077_v43 }
 0x3a0   :  { %1343 = vmatpush.msrb.mxu2 %v3078_v45  ;;  %1363 = vmatpush.msrb.mxu3 %v3079_v42 }
 0x3a1   :  { %1304 = vmatpush.msrb.mxu0 %v3080_v41  ;;  %1324 = vmatpush.msrb.mxu1 %v3081_v15 }
 0x3a2   :  { %1344 = vmatpush.msrb.mxu2 %v3082_v16  ;;  %1364 = vmatpush.msrb.mxu3 %v3083_v17 }
 0x3fe   :  { %v1012_v27 = vpop.f32.mrf.mxu0  ;;  %v1032_v29 = vpop.f32.mrf.mxu1 }
 0x3ff   :  { %v1075_v31 = vadd.f32 %v1012_v27, %v182_v24  ;;  %v1076_v9 = vadd.f32 %v1032_v29, %v183_v26 }
 0x401   :  { %v1515_v13 = vmul.f32 -1.442695, %v1075_v31  ;;  %v1516_v28 = vmul.f32 -1.442695, %v1076_v9 }
 0x403   :  { %1617 = vpow2.f32 %v1515_v13 }
 0x404   :  { %1619 = vpow2.f32 %v1516_v28 }
 0x405   :  { %v1052_v36 = vpop.f32.mrf.mxu2  ;;  %v1072_v35 = vpop.f32.mrf.mxu3 }
 0x406   :  { %v1077_v1 = vadd.f32 %v1052_v36, %v184_v12  ;;  %v1078_v3 = vadd.f32 %v1072_v35, %v185_v5 }
 0x408   :  { %v1517_v30 = vmul.f32 -1.442695, %v1077_v1 }
 0x409   :  { %v1618_v38 = vpop.eup %1617 }
 0x40a   :  { %v1620_v11 = vpop.eup %1619  ;;  %v1088_v52 = vadd.f32 1.0, %v1618_v38  ;;  %1621 = vpow2.f32 %v1517_v30 }
 0x40b   :  { %v1089_v6 = vadd.f32 1.0, %v1620_v11 }
 0x40c   :  { %1623 = vrcp.f32 %v1088_v52  ;;  %v1102_v49 = vand.u32 2147483648, %v1088_v52  ;;  %v1100_v48 = vand.u32 2147483647, %v1088_v52  ;;  %vm1096_vm14 = vweird.f32 %v1088_v52 }
 0x40d   :  { %1625 = vrcp.f32 %v1089_v6  ;;  %v1117_v57 = vand.u32 2147483648, %v1089_v6  ;;  %v1115_v51 = vand.u32 2147483647, %v1089_v6  ;;  %vm1111_vm15 = vweird.f32 %v1089_v6 }
 0x40e   :  { %v1103_v62 = vor.u32 1.1754944e-38, %v1102_v49  ;;  %vm1101_vm2 = vcmp.eq.f32.partialorder %v1100_v48, 8.507059e+37 }
 0x40f   :  { %v1118_v0 = vor.u32 1.1754944e-38, %v1117_v57  ;;  %vm1116_vm3 = vcmp.eq.f32.partialorder %v1115_v51, 8.507059e+37 }
 0x410   :  { %v1622_v8 = vpop.eup %1621 }
 0x411   :  { %v1090_v14 = vadd.f32 1.0, %v1622_v8 }
 0x412   :  { %v1624_v37 = vpop.eup %1623 }
 0x413   :  { %v1626_v2 = vpop.eup %1625  ;;  %v1092_v33 = vmul.f32 %v1624_v37, %v1088_v52  ;;  %1627 = vrcp.f32 %v1090_v14  ;;  %vm1097_vm12 = vweird.f32 %v1624_v37  ;;  %v1132_v18 = vand.u32 2147483648, %v1090_v14 }
 0x414   :  { %v1107_v60 = vmul.f32 %v1626_v2, %v1089_v6  ;;  %1629 = vtanh.f32 %v1078_v3  ;;  %vm1112_vm13 = vweird.f32 %v1626_v2  ;;  %vm1098_vm0 = vmor %vm1096_vm14, %vm1097_vm12  ;;  %vm1126_vm5 = vweird.f32 %v1090_v14 }
 0x415   :  { %v1093_v39 = vsub.f32 1.0, %v1092_v33  ;;  %vm1113_vm1 = vmor %vm1111_vm15, %vm1112_vm13  ;;  %v1130_v20 = vand.u32 2147483647, %v1090_v14  ;;  %v1133_v24 = vor.u32 1.1754944e-38, %v1132_v18 }
 0x416   :  { %v1108_v40 = vsub.f32 1.0, %v1107_v60 }
 0x417   :  { %v1094_v56 = vmul.f32 %v1624_v37, %v1093_v39  ;;  %vm1131_vm7 = vcmp.eq.f32.partialorder %v1130_v20, 8.507059e+37 }
 0x418   :  { %v1109_v50 = vmul.f32 %v1626_v2, %v1108_v40 }
 0x419   :  { %v1628_v61 = vpop.eup %1627  ;;  %v1095_v59 = vadd.f32 %v1624_v37, %v1094_v56 }
 0x41a   :  { %v1122_v63 = vmul.f32 %v1628_v61, %v1090_v14  ;;  %v1110_v53 = vadd.f32 %v1626_v2, %v1109_v50  ;;  %v1630_v58 = vpop.eup %1629  ;;  %vm1127_vm4 = vweird.f32 %v1628_v61 }
 0x41b   :  { %v1099_v46 = vsel %vm1098_vm0, %v1624_v37, %v1095_v59  ;;  %vm1128_vm6 = vmor %vm1126_vm5, %vm1127_vm4 }
 0x41c   :  { %v1123_v47 = vsub.f32 1.0, %v1122_v63  ;;  %v1104_v55 = vsel %vm1101_vm2, %v1103_v62, %v1099_v46  ;;  %v1114_v43 = vsel %vm1113_vm1, %v1626_v2, %v1110_v53 }
 0x41d   :  { %v1119_v45 = vsel %vm1116_vm3, %v1118_v0, %v1114_v43  ;;  %v1138_v42 = vmul.f32 %v1630_v58, %v1104_v55 }
 0x41e   :  { %v1137_v41 = vmul.f32 %v1119_v45, %v2663_v10  ;;  %v1124_v15 = vmul.f32 %v1628_v61, %v1123_v47  ;;  %v105_v10 = vpop.permute.xlu0 %104 }
 0x41f   :  { %v145_v31 = vmul.f32 %v3084_v19, %v105_v10  ;;  %v146_v9 = vmul.f32 %v3085_v21, %v105_v10  ;;  %v147_v30 = vmul.f32 %v3088_v32, %v105_v10  ;;  %v148_v3 = vmul.f32 %v3090_v4, %v105_v10 }
 0x420   :  { %v2739_v16 = vadd.f32 %v1138_v42, %v1137_v41  ;;  %v1125_v17 = vadd.f32 %v1628_v61, %v1124_v15 }
 0x421   :  { %v186_v7 = vadd.f32 %v3086_v23, %v145_v31  ;;  %v187_v13 = vadd.f32 %v3087_v25, %v146_v9  ;;  %v188_v52 = vadd.f32 %v3089_v44, %v147_v30  ;;  %v189_v60 = vadd.f32 %v3091_v54, %v148_v3  ;;  %v1453_v30 = vld [vmem:[#allocation7 + $0x60] sm:$0xff]  ;;  %v1447_v3 = vld [vmem:[#allocation7 + $0x30] sm:$0xff] }
 0x422   :  { %1631 = vtanh.f32 %v2739_v16  ;;  %v1129_v22 = vsel %vm1128_vm6, %v1628_v61, %v1125_v17 }
 0x423   :  { %v1134_v27 = vsel %vm1131_vm7, %v1133_v24, %v1129_v22 }
 0x428   :  { %v1632_v26 = vpop.eup %1631 }
 0x429   :  { %v1141_v29 = vmul.f32 %v1632_v26, %v1134_v27 }
 0x42b   :  { %1158 = vmatmul.f32.vlgmr.msra.gmra.mxu0 %v1141_v29  ;;  %1178 = vmatmul.f32.vlgmr.msra.gmra.mxu1 %v1141_v29 }
 0x42c   :  { %1198 = vmatmul.f32.vlgmr.msra.gmra.mxu2 %v1141_v29  ;;  %1218 = vmatmul.f32.vlgmr.msra.gmra.mxu3 %v1141_v29 }
 0x4a8   :  { %v1159_v28 = vpop.f32.mrf.mxu0  ;;  %v1179_v12 = vpop.f32.mrf.mxu1 }
 0x4a9   :  { %v1222_v36 = vadd.f32 %v1159_v28, %v186_v7  ;;  %v1223_v1 = vadd.f32 %v1179_v12, %v187_v13 }
 0x4ab   :  { %v1518_v38 = vmul.f32 -1.442695, %v1222_v36  ;;  %v1519_v11 = vmul.f32 -1.442695, %v1223_v1  ;;  %v1455_v36 = vld [vmem:[#allocation7 + $0x70] sm:$0xff]  ;;  %v1454_v1 = vld [vmem:[#allocation7 + $0x68] sm:$0xff] }
 0x4ad   :  { %1633 = vpow2.f32 %v1518_v38  ;;  %v1452_v38 = vld [vmem:[#allocation7 + $0x58] sm:$0xff] }
 0x4ae   :  { %1635 = vpow2.f32 %v1519_v11  ;;  %v1451_v11 = vld [vmem:[#allocation7 + $0x50] sm:$0xff] }
 0x4af   :  { %v1199_v6 = vpop.f32.mrf.mxu2  ;;  %v1219_v2 = vpop.f32.mrf.mxu3 }
 0x4b0   :  { %v1224_v34 = vadd.f32 %v1199_v6, %v188_v52  ;;  %v1225_v49 = vadd.f32 %v1219_v2, %v189_v60  ;;  %v110_v52 = vpop.permute.xlu1 %109  ;;  %v1450_v6 = vld [vmem:[#allocation7 + $0x48] sm:$0xff] }
 0x4b2   :  { %v1520_v35 = vmul.f32 -1.442695, %v1224_v34  ;;  %v149_v34 = vmul.f32 %v3084_v19, %v110_v52 }
 0x4b3   :  { %v1634_v8 = vpop.eup %1633 }
 0x4b4   :  { %v1636_v5 = vpop.eup %1635  ;;  %v1235_v14 = vadd.f32 1.0, %v1634_v8  ;;  %1637 = vpow2.f32 %v1520_v35  ;;  %v150_v35 = vmul.f32 %v3085_v21, %v110_v52  ;;  %v1449_v8 = vld [vmem:[#allocation7 + $0x40] sm:$0xff] }
 0x4b5   :  { %v1236_v37 = vadd.f32 1.0, %v1636_v5  ;;  %v1448_v5 = vld [vmem:[#allocation7 + $0x38] sm:$0xff] }
 0x4b6   :  { %1639 = vrcp.f32 %v1235_v14  ;;  %v1249_v61 = vand.u32 2147483648, %v1235_v14  ;;  %v1247_v62 = vand.u32 2147483647, %v1235_v14  ;;  %vm1243_vm10 = vweird.f32 %v1235_v14 }
 0x4b7   :  { %1641 = vrcp.f32 %v1236_v37  ;;  %v1264_v59 = vand.u32 2147483648, %v1236_v37  ;;  %v1262_v0 = vand.u32 2147483647, %v1236_v37  ;;  %vm1258_vm11 = vweird.f32 %v1236_v37 }
 0x4b8   :  { %v1250_v55 = vor.u32 1.1754944e-38, %v1249_v61  ;;  %vm1248_vm14 = vcmp.eq.f32.partialorder %v1247_v62, 8.507059e+37  ;;  %v1441_v61 = vld [vmem:[#allocation7] sm:$0xff] }
 0x4b9   :  { %v1265_v45 = vor.u32 1.1754944e-38, %v1264_v59  ;;  %vm1263_vm15 = vcmp.eq.f32.partialorder %v1262_v0, 8.507059e+37  ;;  %v152_v0 = vmul.f32 %v3090_v4, %v110_v52 }
 0x4ba   :  { %v1638_v33 = vpop.eup %1637 }
 0x4bb   :  { %v1237_v39 = vadd.f32 1.0, %v1638_v33 }
 0x4bc   :  { %v1640_v40 = vpop.eup %1639 }
 0x4bd   :  { %v1642_v57 = vpop.eup %1641  ;;  %v1239_v56 = vmul.f32 %v1640_v40, %v1235_v14  ;;  %1643 = vrcp.f32 %v1237_v39  ;;  %vm1244_vm8 = vweird.f32 %v1640_v40  ;;  %v1279_v10 = vand.u32 2147483648, %v1237_v39 }
 0x4be   :  { %v1254_v48 = vmul.f32 %v1642_v57, %v1236_v37  ;;  %1645 = vtanh.f32 %v1225_v49  ;;  %vm1259_vm9 = vweird.f32 %v1642_v57  ;;  %vm1245_vm12 = vmor %vm1243_vm10, %vm1244_vm8  ;;  %vm1273_vm1 = vweird.f32 %v1237_v39 }
 0x4bf   :  { %v1240_v50 = vsub.f32 1.0, %v1239_v56  ;;  %vm1260_vm13 = vmor %vm1258_vm11, %vm1259_vm9  ;;  %v1277_v31 = vand.u32 2147483647, %v1237_v39  ;;  %v1280_v7 = vor.u32 1.1754944e-38, %v1279_v10  ;;  %v190_v14 = vadd.f32 %v3086_v23, %v149_v34  ;;  %v1444_v56 = vld [vmem:[#allocation7 + $0x18] sm:$0xff] }
 0x4c0   :  { %v1255_v51 = vsub.f32 1.0, %v1254_v48  ;;  %v191_v37 = vadd.f32 %v3087_v25, %v150_v35  ;;  %v151_v49 = vmul.f32 %v3088_v32, %v110_v52  ;;  %v1443_v48 = vld [vmem:[#allocation7 + $0x10] sm:$0xff] }
 0x4c1   :  { %v1241_v63 = vmul.f32 %v1640_v40, %v1240_v50  ;;  %vm1278_vm3 = vcmp.eq.f32.partialorder %v1277_v31, 8.507059e+37  ;;  %v1442_v50 = vld [vmem:[#allocation7 + $0x8] sm:$0xff] }
 0x4c2   :  { %v1256_v53 = vmul.f32 %v1642_v57, %v1255_v51  ;;  %v192_v23 = vadd.f32 %v3089_v44, %v151_v49 }
 0x4c3   :  { %v1644_v46 = vpop.eup %1643  ;;  %v1242_v58 = vadd.f32 %v1640_v40, %v1241_v63 }
 0x4c4   :  { %v1269_v47 = vmul.f32 %v1644_v46, %v1237_v39  ;;  %v1257_v43 = vadd.f32 %v1642_v57, %v1256_v53  ;;  %v1646_v41 = vpop.eup %1645  ;;  %vm1274_vm0 = vweird.f32 %v1644_v46 }
 0x4c5   :  { %v1246_v42 = vsel %vm1245_vm12, %v1640_v40, %v1242_v58  ;;  %vm1275_vm2 = vmor %vm1273_vm1, %vm1274_vm0  ;;  %v1446_v40 = vld [vmem:[#allocation7 + $0x28] sm:$0xff]  ;;  %v193_v58 = vadd.f32 %v3091_v54, %v152_v0 }
 0x4c6   :  { %v1270_v15 = vsub.f32 1.0, %v1269_v47  ;;  %v1251_v17 = vsel %vm1248_vm14, %v1250_v55, %v1246_v42  ;;  %v1261_v18 = vsel %vm1260_vm13, %v1642_v57, %v1257_v43  ;;  %v1445_v57 = vld [vmem:[#allocation7 + $0x20] sm:$0xff] }
 0x4c7   :  { %v1266_v20 = vsel %vm1263_vm15, %v1265_v45, %v1261_v18  ;;  %v1285_v22 = vmul.f32 %v1646_v41, %v1251_v17 }
 0x4c8   :  { %v1284_v24 = vmul.f32 %v1266_v20, %v2739_v16  ;;  %v1271_v26 = vmul.f32 %v1644_v46, %v1270_v15  ;;  %v1456_v16 = vld [vmem:[#allocation7 + $0x78] sm:$0xff] }
 0x4c9   :  { %1461 = vmatpush.msra.mxu0 %v1456_v16 }
 0x4ca   :  { %v2751_v27 = vadd.f32 %v1285_v22, %v1284_v24  ;;  %v1272_v29 = vadd.f32 %v1644_v46, %v1271_v26 }
 0x4cb   :  { %1462 = vmatpush.msra.mxu0 %v1455_v36 }
 0x4cc   :  { %1647 = vtanh.f32 %v2751_v27  ;;  %v1276_v9 = vsel %vm1275_vm2, %v1644_v46, %v1272_v29 }
 0x4cd   :  { %v1281_v28 = vsel %vm1278_vm3, %v1280_v7, %v1276_v9  ;;  %1463 = vmatpush.msra.mxu0 %v1454_v1 }
 0x4cf   :  { %1464 = vmatpush.msra.mxu0 %v1453_v30 }
 0x4d1   :  { %1465 = vmatpush.msra.mxu0 %v1452_v38 }
 0x4d2   :  { %v1648_v13 = vpop.eup %1647 }
 0x4d3   :  { %v1288_v12 = vmul.f32 %v1648_v13, %v1281_v28  ;;  %1466 = vmatpush.msra.mxu0 %v1451_v11 }
 0x4d5   :  { %1305 = vmatmul.f32.vlgmr.msrb.gmra.mxu0 %v1288_v12  ;;  %1325 = vmatmul.f32.vlgmr.msrb.gmra.mxu1 %v1288_v12 }
 0x4d6   :  { %1345 = vmatmul.f32.vlgmr.msrb.gmra.mxu2 %v1288_v12  ;;  %1365 = vmatmul.f32.vlgmr.msrb.gmra.mxu3 %v1288_v12 }
 0x4d7   :  { %1467 = vmatpush.msra.mxu0 %v1450_v6 }
 0x4d9   :  { %1468 = vmatpush.msra.mxu0 %v1449_v8 }
 0x4db   :  { %1469 = vmatpush.msra.mxu0 %v1448_v5 }
 0x4dd   :  { %1470 = vmatpush.msra.mxu0 %v1447_v3 }
 0x4df   :  { %1471 = vmatpush.msra.mxu0 %v1446_v40 }
 0x4e1   :  { %1472 = vmatpush.msra.mxu0 %v1445_v57 }
 0x4e3   :  { %1473 = vmatpush.msra.mxu0 %v1444_v56 }
 0x4e5   :  { %1474 = vmatpush.msra.mxu0 %v1443_v48 }
 0x4e7   :  { %1475 = vmatpush.msra.mxu0 %v1442_v50 }
 0x4e9   :  { %1476 = vmatpush.msra.mxu0 %v1441_v61 }
 0x552   :  { %v1306_v2 = vpop.f32.mrf.mxu0  ;;  %v1326_v33 = vpop.f32.mrf.mxu1 }
 0x553   :  { %v1369_v60 = vadd.f32 %v1306_v2, %v190_v14  ;;  %v1370_v39 = vadd.f32 %v1326_v33, %v191_v37 }
 0x555   :  { %v1521_v19 = vmul.f32 -1.442695, %v1369_v60  ;;  %v1522_v21 = vmul.f32 -1.442695, %v1370_v39 }
 0x557   :  { %1649 = vpow2.f32 %v1521_v19 }
 0x558   :  { %1651 = vpow2.f32 %v1522_v21 }
 0x559   :  { %v1346_v25 = vpop.f32.mrf.mxu2  ;;  %v1366_v46 = vpop.f32.mrf.mxu3 }
 0x55a   :  { %v1371_v51 = vadd.f32 %v1346_v25, %v192_v23  ;;  %v1372_v43 = vadd.f32 %v1366_v46, %v193_v58 }
 0x55c   :  { %v1523_v59 = vmul.f32 -1.442695, %v1371_v51 }
 0x55d   :  { %v1650_v32 = vpop.eup %1649 }
 0x55e   :  { %v1652_v63 = vpop.eup %1651  ;;  %v1382_v62 = vadd.f32 1.0, %v1650_v32  ;;  %1653 = vpow2.f32 %v1523_v59 }
 0x55f   :  { %v1383_v53 = vadd.f32 1.0, %v1652_v63 }
 0x560   :  { %1655 = vrcp.f32 %v1382_v62  ;;  %v1396_v18 = vand.u32 2147483648, %v1382_v62  ;;  %v1394_v4 = vand.u32 2147483647, %v1382_v62  ;;  %vm1390_vm6 = vweird.f32 %v1382_v62 }
 0x561   :  { %1657 = vrcp.f32 %v1383_v53  ;;  %v1411_v20 = vand.u32 2147483648, %v1383_v53  ;;  %v1409_v26 = vand.u32 2147483647, %v1383_v53  ;;  %vm1405_vm7 = vweird.f32 %v1383_v53 }
 0x562   :  { %v1397_v31 = vor.u32 1.1754944e-38, %v1396_v18  ;;  %vm1395_vm10 = vcmp.eq.f32.partialorder %v1394_v4, 8.507059e+37 }
 0x563   :  { %v1412_v7 = vor.u32 1.1754944e-38, %v1411_v20  ;;  %vm1410_vm11 = vcmp.eq.f32.partialorder %v1409_v26, 8.507059e+37 }
 0x564   :  { %v1654_v44 = vpop.eup %1653 }
 0x565   :  { %v1384_v47 = vadd.f32 1.0, %v1654_v44 }
 0x566   :  { %v1656_v55 = vpop.eup %1655 }
 0x567   :  { %v1658_v45 = vpop.eup %1657  ;;  %v1386_v42 = vmul.f32 %v1656_v55, %v1382_v62  ;;  %1659 = vrcp.f32 %v1384_v47  ;;  %vm1391_vm4 = vweird.f32 %v1656_v55  ;;  %v1426_v34 = vand.u32 2147483648, %v1384_v47 }
 0x568   :  { %v1401_v41 = vmul.f32 %v1658_v45, %v1383_v53  ;;  %1661 = vtanh.f32 %v1372_v43  ;;  %vm1406_vm5 = vweird.f32 %v1658_v45  ;;  %vm1392_vm8 = vmor %vm1390_vm6, %vm1391_vm4  ;;  %vm1420_vm13 = vweird.f32 %v1384_v47 }
 0x569   :  { %v1387_v15 = vsub.f32 1.0, %v1386_v42  ;;  %vm1407_vm9 = vmor %vm1405_vm7, %vm1406_vm5  ;;  %v1424_v35 = vand.u32 2147483647, %v1384_v47  ;;  %v1427_v5 = vor.u32 1.1754944e-38, %v1426_v34 }
 0x56a   :  { %v1402_v17 = vsub.f32 1.0, %v1401_v41 }
 0x56b   :  { %v1388_v22 = vmul.f32 %v1656_v55, %v1387_v15  ;;  %vm1425_vm15 = vcmp.eq.f32.partialorder %v1424_v35, 8.507059e+37 }
 0x56c   :  { %v1403_v24 = vmul.f32 %v1658_v45, %v1402_v17 }
 0x56d   :  { %v1660_v29 = vpop.eup %1659  ;;  %v1389_v54 = vadd.f32 %v1656_v55, %v1388_v22 }
 0x56e   :  { %v1416_v10 = vmul.f32 %v1660_v29, %v1384_v47  ;;  %v1404_v9 = vadd.f32 %v1658_v45, %v1403_v24  ;;  %v1662_v28 = vpop.eup %1661  ;;  %vm1421_vm12 = vweird.f32 %v1660_v29 }
 0x56f   :  { %v1393_v13 = vsel %vm1392_vm8, %v1656_v55, %v1389_v54  ;;  %vm1422_vm14 = vmor %vm1420_vm13, %vm1421_vm12 }
 0x570   :  { %v1417_v12 = vsub.f32 1.0, %v1416_v10  ;;  %v1398_v16 = vsel %vm1395_vm10, %v1397_v31, %v1393_v13  ;;  %v1408_v36 = vsel %vm1407_vm9, %v1658_v45, %v1404_v9 }
 0x571   :  { %v1413_v1 = vsel %vm1410_vm11, %v1412_v7, %v1408_v36  ;;  %v1432_v30 = vmul.f32 %v1662_v28, %v1398_v16 }
 0x572   :  { %v1431_v38 = vmul.f32 %v1413_v1, %v2751_v27  ;;  %v1418_v11 = vmul.f32 %v1660_v29, %v1417_v12  ;;  %v1536_v27 = vld [vmem:[%s2774_s5] ss:$0 sm:$0xff] }
 0x574   :  { %v1433_v52 = vadd.f32 %v1432_v30, %v1431_v38  ;;  %v1419_v6 = vadd.f32 %v1660_v29, %v1418_v11 }
 0x576   :  { %1663 = vtanh.f32 %v1433_v52  ;;  %v1423_v8 = vsel %vm1422_vm14, %v1660_v29, %v1419_v6 }
 0x577   :  { %v1428_v37 = vsel %vm1425_vm15, %v1427_v5, %v1423_v8 }
 0x57c   :  { %v1664_v14 = vpop.eup %1663 }
 0x57d   :  { %v1435_v3 = vmul.f32 %v1664_v14, %v1428_v37 }
 0x57f   :  { %1477 = vmatmul.f32.vlgmr.msra.gmra.mxu0 %v1435_v3 }
 0x5fc   :  { %v1478_v2 = vpop.f32.mrf.mxu0 }
 0x5fd   :  { %v1479_v33 = vadd.f32 %v1536_v27, %v1478_v2 }
 0x5ff   :  { %1481 = vst [vmem:[#allocation9] sm:$0xff] %v1479_v33 }
 0x600   :  { %1492 = dma.vmem_to_hbm [thread:$0]  %s1488_s29, 128, %s1490_s8, [#allocation6]  }
 0x601   :  { %1805 = dma.done.wait [#allocation6], 128  }
 0x602   :  { %1806 = vsyncadd [#allocation6], 4294967168 }
 0x603   :  { %1497 = vsyncpa [#allocation5], 1 }
 0x604   :  { %1498 = vsyncpa [#allocation8], 1 }
 0x605   :  { %1499 = vsyncpa [#allocation6], 1 }

</bundles_post_ra>
